<compile_context>
chip_gen: v6e
topology: v6e:2x2x1
jax: 0.10.0
libtpu: 0.0.40
codegen_flags: <defaults>
</compile_context>

<pallas_src>
import jax
import jax.numpy as jnp
from jax.experimental import pallas as pl
from jax.experimental.pallas import tpu as pltpu

NEG_SLOPE = 0.01                 # nn.LeakyReLU default negative_slope
NUM_CHANNELS_IN_ENCODER = 8

LANE = 128                       # vreg lane width
SUBLANE = 8                      # vreg sublane count (f32)
MAX_TILE_M = 256                 # MXU-aligned M tile cap (2x256^2 on v6e/v7x)
VMEM_LIMIT_BYTES = 48 * 1024 * 1024   # explicit budget, under v7x's 64 MiB VMEM


def _round_up(x, m):
    return ((x + m - 1) // m) * m


def _pick_tile_m(m_padded8):
    """Sublane-aligned M tile: as large as possible (<=256) for MXU utilisation, but
    split so the grid has >=2 programs when M allows (keeps both v7x TCs busy)."""
    tm = min(MAX_TILE_M, m_padded8)
    if tm == m_padded8 and m_padded8 >= 2 * SUBLANE:
        tm = _round_up(m_padded8 // 2, SUBLANE)
    return tm


# ----------------------------------------------------------------------------
# Pallas kernel: fused  out = act(patches @ W + b) [+ residual]
# ----------------------------------------------------------------------------
def _make_conv_gemm_kernel(activation: str, has_residual: bool):
    def kernel(p_ref, w_ref, b_ref, *rest):
        if has_residual:
            r_ref, o_ref = rest
        else:
            (o_ref,) = rest
        # bf16 x bf16 on the MXU, f32 accumulation.
        acc = jnp.dot(p_ref[...], w_ref[...], preferred_element_type=jnp.float32)
        acc = acc + b_ref[...]                       # (1, Cp) f32 broadcast (VPU)
        if activation == "leaky_relu":
            acc = jnp.where(acc >= 0.0, acc, NEG_SLOPE * acc)
        elif activation == "tanh":
            acc = jnp.tanh(acc)                      # EUP
        if has_residual:
            acc = acc + r_ref[...].astype(jnp.float32)
        o_ref[...] = acc.astype(o_ref.dtype)
    return kernel


def conv_gemm(patches, w_mat, b, residual=None, activation="none",
              out_dtype=jnp.bfloat16, pad_cout_to=None):
    """patches: (M, K), w_mat: (K, C_out), b: (C_out,).  Returns (M, C_out)."""
    M, K = patches.shape
    C_out = w_mat.shape[1]

    # Lane/sublane-friendly padding of the GEMM problem.
    Kp = _round_up(K, LANE)                          # lane-dense K loads
    Cp = C_out if pad_cout_to is None else max(C_out, pad_cout_to)  # lane-dense stores
    M8 = _round_up(M, SUBLANE)
    tile_m = _pick_tile_m(M8)
    Mp = _round_up(M8, tile_m)

    patches = jnp.pad(patches, ((0, Mp - M), (0, Kp - K))).astype(jnp.bfloat16)
    w_mat = jnp.pad(w_mat, ((0, Kp - K), (0, Cp - C_out))).astype(jnp.bfloat16)
    b2d = jnp.pad(b, (0, Cp - C_out)).reshape(1, Cp).astype(jnp.float32)

    has_res = residual is not None
    kernel = _make_conv_gemm_kernel(activation, has_res)

    in_specs = [
        pl.BlockSpec((tile_m, Kp), lambda i: (i, 0)),
        pl.BlockSpec((Kp, Cp), lambda i: (0, 0)),
        pl.BlockSpec((1, Cp), lambda i: (0, 0)),
    ]
    args = [patches, w_mat, b2d]
    if has_res:
        residual = jnp.pad(residual,
                           ((0, Mp - M), (0, Cp - C_out))).astype(jnp.bfloat16)
        in_specs.append(pl.BlockSpec((tile_m, Cp), lambda i: (i, 0)))
        args.append(residual)

    out = pl.pallas_call(
        kernel,
        out_shape=jax.ShapeDtypeStruct((Mp, Cp), out_dtype),
        grid=(pl.cdiv(Mp, tile_m),),
        in_specs=in_specs,
        out_specs=pl.BlockSpec((tile_m, Cp), lambda i: (i, 0)),
        compiler_params=pltpu.CompilerParams(
            dimension_semantics=("parallel",),
            vmem_limit_bytes=VMEM_LIMIT_BYTES),
    )(*args)

    if Mp != M or Cp != C_out:
        out = out[:M, :C_out]
    return out


# ----------------------------------------------------------------------------
# Glue: zero-pad + im2col (layout only, no math)
# ----------------------------------------------------------------------------
def im2col_nhwc(x, kh, kw, sh, sw, pad):
    """x: (N, H, W, C). pad = (top, bottom, left, right).  Returns ((M, K), (N,Ho,Wo))."""
    top, bottom, left, right = pad
    x_p = jnp.pad(x, ((0, 0), (top, bottom), (left, right), (0, 0)))
    N, Hp, Wp, C = x_p.shape
    Ho = (Hp - kh) // sh + 1
    Wo = (Wp - kw) // sw + 1
    cols = []
    for i in range(kh):
        for j in range(kw):
            cols.append(x_p[:, i:i + sh * Ho:sh, j:j + sw * Wo:sw, :])
    patches = jnp.concatenate(cols, axis=-1)          # (N, Ho, Wo, kh*kw*C)
    return patches.reshape(N * Ho * Wo, kh * kw * C), (N, Ho, Wo)


def _weight_to_matrix(w):
    """PyTorch (C_out, C_in, kh, kw) -> (kh*kw*C_in, C_out), matching im2col order."""
    c_out, c_in, kh, kw = w.shape
    return jnp.transpose(w, (2, 3, 1, 0)).reshape(kh * kw * c_in, c_out)


def conv_layer(x_nhwc, w, b, stride, pad, activation, residual=None,
               out_dtype=jnp.bfloat16, pad_cout_to=None):
    c_out = w.shape[0]
    kh, kw = w.shape[2], w.shape[3]
    patches, (N, Ho, Wo) = im2col_nhwc(x_nhwc, kh, kw, stride, stride, pad)
    res_flat = None if residual is None else residual.reshape(N * Ho * Wo, c_out)
    out = conv_gemm(patches, _weight_to_matrix(w), b,
                    residual=res_flat, activation=activation,
                    out_dtype=out_dtype, pad_cout_to=pad_cout_to)
    return out.reshape(N, Ho, Wo, c_out)


# ----------------------------------------------------------------------------
# Encoder parameters (deterministic synthetic init) and forward pass
# ----------------------------------------------------------------------------
def init_params(key):
    def conv_init(k, c_out, c_in, kh, kw):
        kw_, kb_ = jax.random.split(k)
        std = 1.0 / jnp.sqrt(float(c_in * kh * kw))
        w = jax.random.normal(kw_, (c_out, c_in, kh, kw), jnp.float32) * std
        b = jax.random.normal(kb_, (c_out,), jnp.float32) * 0.01
        return w, b

    ks = jax.random.split(key, 9)
    return {
        "c1": conv_init(ks[0], 64, 3, 5, 5),
        "c2": conv_init(ks[1], 128, 64, 5, 5),
        "b1a": conv_init(ks[2], 128, 128, 3, 3),
        "b1b": conv_init(ks[3], 128, 128, 3, 3),
        "b2a": conv_init(ks[4], 128, 128, 3, 3),
        "b2b": conv_init(ks[5], 128, 128, 3, 3),
        "b3a": conv_init(ks[6], 128, 128, 3, 3),
        "b3b": conv_init(ks[7], 128, 128, 3, 3),
        "c3": conv_init(ks[8], NUM_CHANNELS_IN_ENCODER, 128, 5, 5),
    }


def encoder_forward(params, x_nchw):
    # NCHW in (PyTorch convention) -> NHWC bf16 internally -> NCHW f32 out.
    x = jnp.transpose(x_nchw, (0, 2, 3, 1)).astype(jnp.bfloat16)
    # ZeroPad2d((l=1, r=2, t=1, b=2)) -> pad tuple (top, bottom, left, right)
    PAD_5 = (1, 2, 1, 2)
    PAD_3 = (1, 1, 1, 1)
    PAD_C3 = (2, 2, 2, 2)     # Conv2d(padding=(2, 2))

    ec1 = conv_layer(x, *params["c1"], 2, PAD_5, "leaky_relu")
    ec2 = conv_layer(ec1, *params["c2"], 2, PAD_5, "leaky_relu")

    def block(x_in, wa, ba, wb, bb):
        h = conv_layer(x_in, wa, ba, 1, PAD_3, "leaky_relu")
        # second conv has no activation; residual add fused into the kernel
        return conv_layer(h, wb, bb, 1, PAD_3, "none", residual=x_in)

    eb1 = block(ec2, *params["b1a"], *params["b1b"])
    eb2 = block(eb1, *params["b2a"], *params["b2b"])
    eb3 = block(eb2, *params["b3a"], *params["b3b"])

    # Final layer: lane-dense 128-wide store inside the kernel (C_out padded 8->128
    # with zero weights/bias), sliced back to 8 channels; emitted in f32.
    ec3 = conv_layer(eb3, *params["c3"], 1, PAD_C3, "tanh",
                     out_dtype=jnp.float32, pad_cout_to=LANE)
    return jnp.transpose(ec3, (0, 3, 1, 2))           # back to NCHW


# ----------------------------------------------------------------------------
# Pure-JAX f32 reference (lax.conv) for a numerical sanity check
# ----------------------------------------------------------------------------
def ref_forward(params, x):
    def conv(xi, w, b, stride, pad):
        t, bo, l, r = pad
        out = jax.lax.conv_general_dilated(
            xi, w, (stride, stride), [(t, bo), (l, r)],
            dimension_numbers=("NCHW", "OIHW", "NCHW"))
        return out + b.reshape(1, -1, 1, 1)

    def lrelu(v):
        return jnp.where(v >= 0, v, NEG_SLOPE * v)

    ec1 = lrelu(conv(x, *params["c1"], 2, (1, 2, 1, 2)))
    ec2 = lrelu(conv(ec1, *params["c2"], 2, (1, 2, 1, 2)))

    def block(xi, wa, ba, wb, bb):
        h = lrelu(conv(xi, wa, ba, 1, (1, 1, 1, 1)))
        return conv(h, wb, bb, 1, (1, 1, 1, 1)) + xi

    eb1 = block(ec2, *params["b1a"], *params["b1b"])
    eb2 = block(eb1, *params["b2a"], *params["b2b"])
    eb3 = block(eb2, *params["b3a"], *params["b3b"])
    return jnp.tanh(conv(eb3, *params["c3"], 1, (2, 2, 2, 2)))


if __name__ == "__main__":
    key = jax.random.PRNGKey(0)
    pkey, xkey = jax.random.split(key)
    params = init_params(pkey)
    x = jax.random.normal(xkey, (2, 3, 16, 16), jnp.float32)   # NCHW, like PyTorch

    out = jax.jit(encoder_forward)(params, x)
    out = jax.block_until_ready(out)

    assert out.shape == (2, NUM_CHANNELS_IN_ENCODER, 4, 4), out.shape
    assert bool(jnp.all(jnp.isfinite(out)))

    ref = ref_forward(params, x)
    assert bool(jnp.allclose(out, ref, rtol=5e-2, atol=5e-2))

    print("KERNEL_OK")
</pallas_src>

<mosaic_0001>
module attributes {stable_mosaic.version = 11 : i64} {
  func.func @kernel(%arg0: i32, %arg1: memref<64x128xbf16, #tpu.memory_space<vmem>>, %arg2: memref<128x64xbf16, #tpu.memory_space<vmem>>, %arg3: memref<1x64xf32, #tpu.memory_space<vmem>>, %arg4: memref<64x64xbf16, #tpu.memory_space<vmem>>) attributes {dimension_semantics = [#tpu.dimension_semantics<parallel>], iteration_bounds = array<i64: 2>, scalar_prefetch = 0 : i64, scratch_operands = 0 : i64, tpu.core_type = #tpu.core_type<tc>, window_params = [{transform_indices = @transform_0, window_bounds = array<i64: 64, 128>}, {pipeline_mode = #tpu.pipeline_mode<synchronous>, transform_indices = @transform_1, window_bounds = array<i64: 128, 64>}, {pipeline_mode = #tpu.pipeline_mode<synchronous>, transform_indices = @transform_2, window_bounds = array<i64: 1, 64>}, {transform_indices = @transform_3, window_bounds = array<i64: 64, 64>}]} {
    %c0 = arith.constant 0 : index
    %c0_0 = arith.constant 0 : index
    %0 = vector.load %arg1[%c0, %c0_0] : memref<64x128xbf16, #tpu.memory_space<vmem>>, vector<64x128xbf16>
    %c0_1 = arith.constant 0 : index
    %c0_2 = arith.constant 0 : index
    %1 = vector.load %arg2[%c0_1, %c0_2] : memref<128x64xbf16, #tpu.memory_space<vmem>>, vector<128x64xbf16>
    %cst = arith.constant dense<0.000000e+00> : vector<64x64xf32>
    %2 = tpu.matmul %0, %1, %cst {dimension_numbers = #tpu.dot_dimension_numbers<[1], [0], [0], [1], [0, 0, 1, 1], [], []>} : vector<64x128xbf16>, vector<128x64xbf16>, vector<64x64xf32> -> vector<64x64xf32>
    %c0_3 = arith.constant 0 : index
    %c0_4 = arith.constant 0 : index
    %3 = vector.load %arg3[%c0_3, %c0_4] : memref<1x64xf32, #tpu.memory_space<vmem>>, vector<1x64xf32>
    %4 = vector.broadcast %3 : vector<1x64xf32> to vector<64x64xf32>
    %5 = arith.addf %2, %4 : vector<64x64xf32>
    %cst_5 = arith.constant 0.000000e+00 : f32
    %6 = vector.broadcast %cst_5 : f32 to vector<64x64xf32>
    %7 = arith.cmpf oge, %5, %6 : vector<64x64xf32>
    %cst_6 = arith.constant 0.00999999977 : f32
    %8 = vector.broadcast %cst_6 : f32 to vector<64x64xf32>
    %9 = arith.mulf %8, %5 : vector<64x64xf32>
    %10 = arith.select %7, %5, %9 : vector<64x64xi1>, vector<64x64xf32>
    %11 = arith.truncf %10 : vector<64x64xf32> to vector<64x64xbf16>
    %c0_7 = arith.constant 0 : index
    %c0_8 = arith.constant 0 : index
    %12 = vector.load %arg4[%c0_7, %c0_8] : memref<64x64xbf16, #tpu.memory_space<vmem>>, vector<64x64xbf16>
    tpu.vector_store %arg4[%c0_7, %c0_8], %11 {strides = array<i32>} : memref<64x64xbf16, #tpu.memory_space<vmem>>, vector<64x64xbf16>,
    return
  }
  func.func @transform_0(%arg0: i32) -> (i32, i32) {
    %c0_i32 = arith.constant 0 : i32
    %c0_i32_0 = arith.constant 0 : i32
    return %arg0, %c0_i32 : i32, i32
  }
  func.func @transform_1(%arg0: i32) -> (i32, i32) {
    %c0_i32 = arith.constant 0 : i32
    %c0_i32_0 = arith.constant 0 : i32
    %c0_i32_1 = arith.constant 0 : i32
    return %c0_i32, %c0_i32_0 : i32, i32
  }
  func.func @transform_2(%arg0: i32) -> (i32, i32) {
    %c0_i32 = arith.constant 0 : i32
    %c0_i32_0 = arith.constant 0 : i32
    %c0_i32_1 = arith.constant 0 : i32
    return %c0_i32, %c0_i32_0 : i32, i32
  }
  func.func @transform_3(%arg0: i32) -> (i32, i32) {
    %c0_i32 = arith.constant 0 : i32
    %c0_i32_0 = arith.constant 0 : i32
    return %arg0, %c0_i32 : i32, i32
  }
}

module attributes {stable_mosaic.version = 11 : i64} {
  func.func @kernel(%arg0: i32, %arg1: memref<16x1664xbf16, #tpu.memory_space<vmem>>, %arg2: memref<1664x128xbf16, #tpu.memory_space<vmem>>, %arg3: memref<1x128xf32, #tpu.memory_space<vmem>>, %arg4: memref<16x128xbf16, #tpu.memory_space<vmem>>) attributes {dimension_semantics = [#tpu.dimension_semantics<parallel>], iteration_bounds = array<i64: 2>, scalar_prefetch = 0 : i64, scratch_operands = 0 : i64, tpu.core_type = #tpu.core_type<tc>, window_params = [{transform_indices = @transform_0, window_bounds = array<i64: 16, 1664>}, {pipeline_mode = #tpu.pipeline_mode<synchronous>, transform_indices = @transform_1, window_bounds = array<i64: 1664, 128>}, {pipeline_mode = #tpu.pipeline_mode<synchronous>, transform_indices = @transform_2, window_bounds = array<i64: 1, 128>}, {transform_indices = @transform_3, window_bounds = array<i64: 16, 128>}]} {
    %c0 = arith.constant 0 : index
    %c0_0 = arith.constant 0 : index
    %0 = vector.load %arg1[%c0, %c0_0] : memref<16x1664xbf16, #tpu.memory_space<vmem>>, vector<16x1664xbf16>
    %c0_1 = arith.constant 0 : index
    %c0_2 = arith.constant 0 : index
    %1 = vector.load %arg2[%c0_1, %c0_2] : memref<1664x128xbf16, #tpu.memory_space<vmem>>, vector<1664x128xbf16>
    %cst = arith.constant dense<0.000000e+00> : vector<16x128xf32>
    %2 = tpu.matmul %0, %1, %cst {dimension_numbers = #tpu.dot_dimension_numbers<[1], [0], [0], [1], [0, 0, 1, 1], [], []>} : vector<16x1664xbf16>, vector<1664x128xbf16>, vector<16x128xf32> -> vector<16x128xf32>
    %c0_3 = arith.constant 0 : index
    %c0_4 = arith.constant 0 : index
    %3 = vector.load %arg3[%c0_3, %c0_4] : memref<1x128xf32, #tpu.memory_space<vmem>>, vector<1x128xf32>
    %4 = vector.broadcast %3 : vector<1x128xf32> to vector<16x128xf32>
    %5 = arith.addf %2, %4 : vector<16x128xf32>
    %cst_5 = arith.constant 0.000000e+00 : f32
    %6 = vector.broadcast %cst_5 : f32 to vector<16x128xf32>
    %7 = arith.cmpf oge, %5, %6 : vector<16x128xf32>
    %cst_6 = arith.constant 0.00999999977 : f32
    %8 = vector.broadcast %cst_6 : f32 to vector<16x128xf32>
    %9 = arith.mulf %8, %5 : vector<16x128xf32>
    %10 = arith.select %7, %5, %9 : vector<16x128xi1>, vector<16x128xf32>
    %11 = arith.truncf %10 : vector<16x128xf32> to vector<16x128xbf16>
    %c0_7 = arith.constant 0 : index
    %c0_8 = arith.constant 0 : index
    %12 = vector.load %arg4[%c0_7, %c0_8] : memref<16x128xbf16, #tpu.memory_space<vmem>>, vector<16x128xbf16>
    tpu.vector_store %arg4[%c0_7, %c0_8], %11 {strides = array<i32>} : memref<16x128xbf16, #tpu.memory_space<vmem>>, vector<16x128xbf16>,
    return
  }
  func.func @transform_0(%arg0: i32) -> (i32, i32) {
    %c0_i32 = arith.constant 0 : i32
    %c0_i32_0 = arith.constant 0 : i32
    return %arg0, %c0_i32 : i32, i32
  }
  func.func @transform_1(%arg0: i32) -> (i32, i32) {
    %c0_i32 = arith.constant 0 : i32
    %c0_i32_0 = arith.constant 0 : i32
    %c0_i32_1 = arith.constant 0 : i32
    return %c0_i32, %c0_i32_0 : i32, i32
  }
  func.func @transform_2(%arg0: i32) -> (i32, i32) {
    %c0_i32 = arith.constant 0 : i32
    %c0_i32_0 = arith.constant 0 : i32
    %c0_i32_1 = arith.constant 0 : i32
    return %c0_i32, %c0_i32_0 : i32, i32
  }
  func.func @transform_3(%arg0: i32) -> (i32, i32) {
    %c0_i32 = arith.constant 0 : i32
    %c0_i32_0 = arith.constant 0 : i32
    return %arg0, %c0_i32 : i32, i32
  }
}

module attributes {stable_mosaic.version = 11 : i64} {
  func.func @kernel(%arg0: i32, %arg1: memref<16x1152xbf16, #tpu.memory_space<vmem>>, %arg2: memref<1152x128xbf16, #tpu.memory_space<vmem>>, %arg3: memref<1x128xf32, #tpu.memory_space<vmem>>, %arg4: memref<16x128xbf16, #tpu.memory_space<vmem>>) attributes {dimension_semantics = [#tpu.dimension_semantics<parallel>], iteration_bounds = array<i64: 2>, scalar_prefetch = 0 : i64, scratch_operands = 0 : i64, tpu.core_type = #tpu.core_type<tc>, window_params = [{transform_indices = @transform_0, window_bounds = array<i64: 16, 1152>}, {pipeline_mode = #tpu.pipeline_mode<synchronous>, transform_indices = @transform_1, window_bounds = array<i64: 1152, 128>}, {pipeline_mode = #tpu.pipeline_mode<synchronous>, transform_indices = @transform_2, window_bounds = array<i64: 1, 128>}, {transform_indices = @transform_3, window_bounds = array<i64: 16, 128>}]} {
    %c0 = arith.constant 0 : index
    %c0_0 = arith.constant 0 : index
    %0 = vector.load %arg1[%c0, %c0_0] : memref<16x1152xbf16, #tpu.memory_space<vmem>>, vector<16x1152xbf16>
    %c0_1 = arith.constant 0 : index
    %c0_2 = arith.constant 0 : index
    %1 = vector.load %arg2[%c0_1, %c0_2] : memref<1152x128xbf16, #tpu.memory_space<vmem>>, vector<1152x128xbf16>
    %cst = arith.constant dense<0.000000e+00> : vector<16x128xf32>
    %2 = tpu.matmul %0, %1, %cst {dimension_numbers = #tpu.dot_dimension_numbers<[1], [0], [0], [1], [0, 0, 1, 1], [], []>} : vector<16x1152xbf16>, vector<1152x128xbf16>, vector<16x128xf32> -> vector<16x128xf32>
    %c0_3 = arith.constant 0 : index
    %c0_4 = arith.constant 0 : index
    %3 = vector.load %arg3[%c0_3, %c0_4] : memref<1x128xf32, #tpu.memory_space<vmem>>, vector<1x128xf32>
    %4 = vector.broadcast %3 : vector<1x128xf32> to vector<16x128xf32>
    %5 = arith.addf %2, %4 : vector<16x128xf32>
    %cst_5 = arith.constant 0.000000e+00 : f32
    %6 = vector.broadcast %cst_5 : f32 to vector<16x128xf32>
    %7 = arith.cmpf oge, %5, %6 : vector<16x128xf32>
    %cst_6 = arith.constant 0.00999999977 : f32
    %8 = vector.broadcast %cst_6 : f32 to vector<16x128xf32>
    %9 = arith.mulf %8, %5 : vector<16x128xf32>
    %10 = arith.select %7, %5, %9 : vector<16x128xi1>, vector<16x128xf32>
    %11 = arith.truncf %10 : vector<16x128xf32> to vector<16x128xbf16>
    %c0_7 = arith.constant 0 : index
    %c0_8 = arith.constant 0 : index
    %12 = vector.load %arg4[%c0_7, %c0_8] : memref<16x128xbf16, #tpu.memory_space<vmem>>, vector<16x128xbf16>
    tpu.vector_store %arg4[%c0_7, %c0_8], %11 {strides = array<i32>} : memref<16x128xbf16, #tpu.memory_space<vmem>>, vector<16x128xbf16>,
    return
  }
  func.func @transform_0(%arg0: i32) -> (i32, i32) {
    %c0_i32 = arith.constant 0 : i32
    %c0_i32_0 = arith.constant 0 : i32
    return %arg0, %c0_i32 : i32, i32
  }
  func.func @transform_1(%arg0: i32) -> (i32, i32) {
    %c0_i32 = arith.constant 0 : i32
    %c0_i32_0 = arith.constant 0 : i32
    %c0_i32_1 = arith.constant 0 : i32
    return %c0_i32, %c0_i32_0 : i32, i32
  }
  func.func @transform_2(%arg0: i32) -> (i32, i32) {
    %c0_i32 = arith.constant 0 : i32
    %c0_i32_0 = arith.constant 0 : i32
    %c0_i32_1 = arith.constant 0 : i32
    return %c0_i32, %c0_i32_0 : i32, i32
  }
  func.func @transform_3(%arg0: i32) -> (i32, i32) {
    %c0_i32 = arith.constant 0 : i32
    %c0_i32_0 = arith.constant 0 : i32
    return %arg0, %c0_i32 : i32, i32
  }
}

module attributes {stable_mosaic.version = 11 : i64} {
  func.func @kernel(%arg0: i32, %arg1: memref<16x1152xbf16, #tpu.memory_space<vmem>>, %arg2: memref<1152x128xbf16, #tpu.memory_space<vmem>>, %arg3: memref<1x128xf32, #tpu.memory_space<vmem>>, %arg4: memref<16x128xbf16, #tpu.memory_space<vmem>>, %arg5: memref<16x128xbf16, #tpu.memory_space<vmem>>) attributes {dimension_semantics = [#tpu.dimension_semantics<parallel>], iteration_bounds = array<i64: 2>, scalar_prefetch = 0 : i64, scratch_operands = 0 : i64, tpu.core_type = #tpu.core_type<tc>, window_params = [{transform_indices = @transform_0, window_bounds = array<i64: 16, 1152>}, {pipeline_mode = #tpu.pipeline_mode<synchronous>, transform_indices = @transform_1, window_bounds = array<i64: 1152, 128>}, {pipeline_mode = #tpu.pipeline_mode<synchronous>, transform_indices = @transform_2, window_bounds = array<i64: 1, 128>}, {transform_indices = @transform_3, window_bounds = array<i64: 16, 128>}, {transform_indices = @transform_4, window_bounds = array<i64: 16, 128>}]} {
    %c0 = arith.constant 0 : index
    %c0_0 = arith.constant 0 : index
    %0 = vector.load %arg1[%c0, %c0_0] : memref<16x1152xbf16, #tpu.memory_space<vmem>>, vector<16x1152xbf16>
    %c0_1 = arith.constant 0 : index
    %c0_2 = arith.constant 0 : index
    %1 = vector.load %arg2[%c0_1, %c0_2] : memref<1152x128xbf16, #tpu.memory_space<vmem>>, vector<1152x128xbf16>
    %cst = arith.constant dense<0.000000e+00> : vector<16x128xf32>
    %2 = tpu.matmul %0, %1, %cst {dimension_numbers = #tpu.dot_dimension_numbers<[1], [0], [0], [1], [0, 0, 1, 1], [], []>} : vector<16x1152xbf16>, vector<1152x128xbf16>, vector<16x128xf32> -> vector<16x128xf32>
    %c0_3 = arith.constant 0 : index
    %c0_4 = arith.constant 0 : index
    %3 = vector.load %arg3[%c0_3, %c0_4] : memref<1x128xf32, #tpu.memory_space<vmem>>, vector<1x128xf32>
    %4 = vector.broadcast %3 : vector<1x128xf32> to vector<16x128xf32>
    %5 = arith.addf %2, %4 : vector<16x128xf32>
    %c0_5 = arith.constant 0 : index
    %c0_6 = arith.constant 0 : index
    %6 = vector.load %arg4[%c0_5, %c0_6] : memref<16x128xbf16, #tpu.memory_space<vmem>>, vector<16x128xbf16>
    %7 = arith.extf %6 : vector<16x128xbf16> to vector<16x128xf32>
    %8 = arith.addf %5, %7 : vector<16x128xf32>
    %9 = arith.truncf %8 : vector<16x128xf32> to vector<16x128xbf16>
    %c0_7 = arith.constant 0 : index
    %c0_8 = arith.constant 0 : index
    %10 = vector.load %arg5[%c0_7, %c0_8] : memref<16x128xbf16, #tpu.memory_space<vmem>>, vector<16x128xbf16>
    tpu.vector_store %arg5[%c0_7, %c0_8], %9 {strides = array<i32>} : memref<16x128xbf16, #tpu.memory_space<vmem>>, vector<16x128xbf16>,
    return
  }
  func.func @transform_0(%arg0: i32) -> (i32, i32) {
    %c0_i32 = arith.constant 0 : i32
    %c0_i32_0 = arith.constant 0 : i32
    return %arg0, %c0_i32 : i32, i32
  }
  func.func @transform_1(%arg0: i32) -> (i32, i32) {
    %c0_i32 = arith.constant 0 : i32
    %c0_i32_0 = arith.constant 0 : i32
    %c0_i32_1 = arith.constant 0 : i32
    return %c0_i32, %c0_i32_0 : i32, i32
  }
  func.func @transform_2(%arg0: i32) -> (i32, i32) {
    %c0_i32 = arith.constant 0 : i32
    %c0_i32_0 = arith.constant 0 : i32
    %c0_i32_1 = arith.constant 0 : i32
    return %c0_i32, %c0_i32_0 : i32, i32
  }
  func.func @transform_3(%arg0: i32) -> (i32, i32) {
    %c0_i32 = arith.constant 0 : i32
    %c0_i32_0 = arith.constant 0 : i32
    return %arg0, %c0_i32 : i32, i32
  }
  func.func @transform_4(%arg0: i32) -> (i32, i32) {
    %c0_i32 = arith.constant 0 : i32
    %c0_i32_0 = arith.constant 0 : i32
    return %arg0, %c0_i32 : i32, i32
  }
}

module attributes {stable_mosaic.version = 11 : i64} {
  func.func @kernel(%arg0: i32, %arg1: memref<16x3200xbf16, #tpu.memory_space<vmem>>, %arg2: memref<3200x128xbf16, #tpu.memory_space<vmem>>, %arg3: memref<1x128xf32, #tpu.memory_space<vmem>>, %arg4: memref<16x128xf32, #tpu.memory_space<vmem>>) attributes {dimension_semantics = [#tpu.dimension_semantics<parallel>], iteration_bounds = array<i64: 2>, scalar_prefetch = 0 : i64, scratch_operands = 0 : i64, tpu.core_type = #tpu.core_type<tc>, window_params = [{transform_indices = @transform_0, window_bounds = array<i64: 16, 3200>}, {pipeline_mode = #tpu.pipeline_mode<synchronous>, transform_indices = @transform_1, window_bounds = array<i64: 3200, 128>}, {pipeline_mode = #tpu.pipeline_mode<synchronous>, transform_indices = @transform_2, window_bounds = array<i64: 1, 128>}, {transform_indices = @transform_3, window_bounds = array<i64: 16, 128>}]} {
    %c0 = arith.constant 0 : index
    %c0_0 = arith.constant 0 : index
    %0 = vector.load %arg1[%c0, %c0_0] : memref<16x3200xbf16, #tpu.memory_space<vmem>>, vector<16x3200xbf16>
    %c0_1 = arith.constant 0 : index
    %c0_2 = arith.constant 0 : index
    %1 = vector.load %arg2[%c0_1, %c0_2] : memref<3200x128xbf16, #tpu.memory_space<vmem>>, vector<3200x128xbf16>
    %cst = arith.constant dense<0.000000e+00> : vector<16x128xf32>
    %2 = tpu.matmul %0, %1, %cst {dimension_numbers = #tpu.dot_dimension_numbers<[1], [0], [0], [1], [0, 0, 1, 1], [], []>} : vector<16x3200xbf16>, vector<3200x128xbf16>, vector<16x128xf32> -> vector<16x128xf32>
    %c0_3 = arith.constant 0 : index
    %c0_4 = arith.constant 0 : index
    %3 = vector.load %arg3[%c0_3, %c0_4] : memref<1x128xf32, #tpu.memory_space<vmem>>, vector<1x128xf32>
    %4 = vector.broadcast %3 : vector<1x128xf32> to vector<16x128xf32>
    %5 = arith.addf %2, %4 : vector<16x128xf32>
    %6 = math.tanh %5 : vector<16x128xf32>
    %c0_5 = arith.constant 0 : index
    %c0_6 = arith.constant 0 : index
    %7 = vector.load %arg4[%c0_5, %c0_6] : memref<16x128xf32, #tpu.memory_space<vmem>>, vector<16x128xf32>
    tpu.vector_store %arg4[%c0_5, %c0_6], %6 {strides = array<i32>} : memref<16x128xf32, #tpu.memory_space<vmem>>, vector<16x128xf32>,
    return
  }
  func.func @transform_0(%arg0: i32) -> (i32, i32) {
    %c0_i32 = arith.constant 0 : i32
    %c0_i32_0 = arith.constant 0 : i32
    return %arg0, %c0_i32 : i32, i32
  }
  func.func @transform_1(%arg0: i32) -> (i32, i32) {
    %c0_i32 = arith.constant 0 : i32
    %c0_i32_0 = arith.constant 0 : i32
    %c0_i32_1 = arith.constant 0 : i32
    return %c0_i32, %c0_i32_0 : i32, i32
  }
  func.func @transform_2(%arg0: i32) -> (i32, i32) {
    %c0_i32 = arith.constant 0 : i32
    %c0_i32_0 = arith.constant 0 : i32
    %c0_i32_1 = arith.constant 0 : i32
    return %c0_i32, %c0_i32_0 : i32, i32
  }
  func.func @transform_3(%arg0: i32) -> (i32, i32) {
    %c0_i32 = arith.constant 0 : i32
    %c0_i32_0 = arith.constant 0 : i32
    return %arg0, %c0_i32 : i32, i32
  }
}

</mosaic_0001>

<bundles_post_ra>
// kernel: encoder_forward.9
= control target key start
LH: loop header
LB: loop body
LE: loop exit
PB: predicated region body
PF: predicated region fallthrough
CT: control target
= control target key end

     0   :  { %s604_s12 = smov 0   ;;  %s679_s0 = inlined_call_operand.vmem [shape: bf16[128,128], index: 0, kind: input, shape index: {}]   ;;  %s680_s1 = inlined_call_operand.vmem [shape: bf16[128,64], index: 1, kind: input, shape index: {}]   ;;  %s681_s2 = inlined_call_operand.vmem [shape: f32[1,64], index: 2, kind: input, shape index: {}]   ;;  %s682_s3 = inlined_call_operand.vmem [shape: bf16[128,64], index: 3, kind: output, shape index: {}]  }
   0x1 LB: > { %s464_s13 = sadd.s32 4294967295, %s582_s12   ;;  %p468_p0 = scmp.ge.s32.totalorder %s582_s12, 1  ;;  %s582_s12 = sphi %s604_s12, %s13_s12  }
   0x2   : > { %p138_p1 = scmp.lt.s32.totalorder %s582_s12, 3 }
   0x4   : > { %p139_p2 = pnand %p468_p0, %p138_p1 }
   0x5   : > { %s469_s16 = sshll.u32 (!%p139_p2), %s464_s13, 3 }
   0x6   : > { %142 = sbr.rel (%p139_p2) target bundleno = 253 (0xfd), region = 32  ;;  %p163_p3 = scmp.lt.s32.totalorder (!%p139_p2), %s469_s16, 15 }
   0xb   : > { %v564_v0 = vld [vmem:[%s680_s1 + $0x38] sm:$0xff]   ;;  %v565_v1 = vld [vmem:[%s680_s1 + $0x30] sm:$0xff]   ;;  %s684_s16 = smov (!%p163_p3, %s469_s16), 15  ;;  %v566_v2 = vld [vmem:[%s680_s1 + $0x28] sm:$0xff]   ;;  %vm399_vm2 = vcmask 519168  }
   0xc   : > { %516 = vmatprep.subr.bf16.mxu0 %v564_v0  ;;  %540 = vmatprep.subr.bf16.mxu1 %v564_v0  ;;  %s470_s21 = sshll.u32 %s684_s16, 2  ;;  %v567_v3 = vld [vmem:[%s680_s1 + $0x20] sm:$0xff]   ;;  %v568_v6 = vld [vmem:[%s680_s1 + $0x18] sm:$0xff]   ;;  %v569_v7 = vld [vmem:[%s680_s1 + $0x10] sm:$0xff]  }
   0xd   : > { %517 = vmatpush3.bf16.msra.mxu0 %v564_v0  ;;  %548 = vmatpush3.bf16.msra.mxu1 %v564_v0  ;;  %s629_s24 = scalar_lea.vmem %s679_s0, %s470_s21  ;;  %v570_v8 = vld [vmem:[%s680_s1 + $0x8] sm:$0xff]   ;;  %v571_v9 = vld [vmem:[%s680_s1] sm:$0xff]   ;;  %s658_s13 = scalar_lea.vmem %s682_s3, %s470_s21 }
   0xe   : > { %518 = vmatprep.subr.bf16.mxu0 %v565_v1  ;;  %541 = vmatprep.subr.bf16.mxu1 %v565_v1  ;;  %v572_v4 = vld [vmem:[%s629_s24] sm:$0xff]   ;;  %v573_v5 = vld [vmem:[%s629_s24 + $0x10] sm:$0xff]   ;;  %v574_v10 = vld [vmem:[%s629_s24 + $0x8] sm:$0xff]  }
   0xf   : > { %532 = vmatprep.mubr.bf16.mxu0 %v572_v4  ;;  %536 = vmatprep.mubr.bf16.mxu1 %v573_v5  ;;  %v575_v11 = vld [vmem:[%s629_s24 + $0x18] sm:$0xff]   ;;  %v473_v12 = vld [vmem:[%s681_s2] ss:$0 sm:$0xff] }
  0x11   : > { %519 = vmatpush3.bf16.msra.mxu0 %v565_v1  ;;  %549 = vmatpush3.bf16.msra.mxu1 %v565_v1 }
  0x12   : > { %520 = vmatprep.subr.bf16.mxu0 %v566_v2  ;;  %542 = vmatprep.subr.bf16.mxu1 %v566_v2 }
  0x15   : > { %521 = vmatpush3.bf16.msra.mxu0 %v566_v2  ;;  %550 = vmatpush3.bf16.msra.mxu1 %v566_v2 }
  0x16   : > { %522 = vmatprep.subr.bf16.mxu0 %v567_v3  ;;  %543 = vmatprep.subr.bf16.mxu1 %v567_v3 }
  0x19   : > { %523 = vmatpush3.bf16.msra.mxu0 %v567_v3  ;;  %551 = vmatpush3.bf16.msra.mxu1 %v567_v3 }
  0x1a   : > { %524 = vmatprep.subr.bf16.mxu0 %v568_v6  ;;  %544 = vmatprep.subr.bf16.mxu1 %v568_v6 }
  0x1d   : > { %525 = vmatpush3.bf16.msra.mxu0 %v568_v6  ;;  %552 = vmatpush3.bf16.msra.mxu1 %v568_v6 }
  0x1e   : > { %526 = vmatprep.subr.bf16.mxu0 %v569_v7  ;;  %545 = vmatprep.subr.bf16.mxu1 %v569_v7 }
  0x21   : > { %527 = vmatpush3.bf16.msra.mxu0 %v569_v7  ;;  %553 = vmatpush3.bf16.msra.mxu1 %v569_v7 }
  0x22   : > { %528 = vmatprep.subr.bf16.mxu0 %v570_v8  ;;  %546 = vmatprep.subr.bf16.mxu1 %v570_v8 }
  0x25   : > { %529 = vmatpush3.bf16.msra.mxu0 %v570_v8  ;;  %554 = vmatpush3.bf16.msra.mxu1 %v570_v8 }
  0x26   : > { %530 = vmatprep.subr.bf16.mxu0 %v571_v9  ;;  %547 = vmatprep.subr.bf16.mxu1 %v571_v9 }
  0x29   : > { %531 = vmatpush3.bf16.msra.mxu0 %v571_v9  ;;  %555 = vmatpush3.bf16.msra.mxu1 %v571_v9 }
  0x2c   : > { %533 = vmatmul.mubr.bf16.vlgmr.msra.gmra.mxu0 %v574_v10  ;;  %537 = vmatmul.mubr.bf16.vlgmr.msra.gmra.mxu1 %v575_v11 }
  0xec   : > { %v534_v13 = vpop.f32.mrf.mxu0  ;;  %v538_v14 = vpop.f32.mrf.mxu1 }
  0xed   : > { %v321_v15 = vadd.f32 %v534_v13, %v473_v12  ;;  %v337_v16 = vadd.f32 %v538_v14, %v473_v12 }
  0xee   : > { %v312_v17 = vpop.f32.mrf.mxu0  ;;  %v328_v18 = vpop.f32.mrf.mxu1 }
  0xef   : > { %vm345_vm0 = vcmp.ge.f32.partialorder %v321_v15, 0.0  ;;  %v353_v19 = vmul.f32 0.01, %v321_v15  ;;  %vm349_vm1 = vcmp.ge.f32.partialorder %v337_v16, 0.0  ;;  %v357_v20 = vmul.f32 0.01, %v337_v16 }
  0xf0   : > { %v313_v21 = vadd.f32 %v473_v12, %v312_v17  ;;  %v329_v22 = vadd.f32 %v473_v12, %v328_v18  ;;  %v535_v23 = vpop.f32.mrf.mxu0  ;;  %v539_v24 = vpop.f32.mrf.mxu1 }
  0xf1   : > { %v361_v25 = vsel %vm345_vm0, %v321_v15, %v353_v19  ;;  %v365_v26 = vsel %vm349_vm1, %v337_v16, %v357_v20  ;;  %v324_v27 = vadd.f32 %v535_v23, %v473_v12  ;;  %v340_v28 = vadd.f32 %v539_v24, %v473_v12 }
  0xf2   : > { %v498_v29 = vpack.c.bf16 %v361_v25, %v361_v25  ;;  %v502_v30 = vpack.c.bf16 %v365_v26, %v365_v26  ;;  %vm343_vm3 = vcmp.ge.f32.partialorder %v313_v21, 0.0  ;;  %v351_v31 = vmul.f32 0.01, %v313_v21  ;;  %v315_v32 = vpop.f32.mrf.mxu0  ;;  %v331_v33 = vpop.f32.mrf.mxu1 }
  0xf3   : > { %vm347_vm4 = vcmp.ge.f32.partialorder %v329_v22, 0.0  ;;  %v355_v34 = vmul.f32 0.01, %v329_v22  ;;  %vm346_vm5 = vcmp.ge.f32.partialorder %v324_v27, 0.0  ;;  %v354_v35 = vmul.f32 0.01, %v324_v27 }
  0xf4   : > { %402 = vst.msk [vmem:[%s658_s13 + $0x8] sm:$0xf] %vm399_vm2, %v498_v29  ;;  %406 = vst.msk [vmem:[%s658_s13 + $0x18] sm:$0xf] %vm399_vm2, %v502_v30  ;;  %v359_v36 = vsel %vm343_vm3, %v313_v21, %v351_v31  ;;  %vm350_vm6 = vcmp.ge.f32.partialorder %v340_v28, 0.0  ;;  %v316_v38 = vadd.f32 %v473_v12, %v315_v32  ;;  %v332_v42 = vadd.f32 %v473_v12, %v331_v33 }
  0xf5   : > { %v358_v37 = vmul.f32 0.01, %v340_v28  ;;  %v496_v39 = vpack.c.bf16 %v359_v36, %v359_v36  ;;  %v363_v40 = vsel %vm347_vm4, %v329_v22, %v355_v34  ;;  %v362_v41 = vsel %vm346_vm5, %v324_v27, %v354_v35 }
  0xf6   : > { %v500_v43 = vpack.c.bf16 %v363_v40, %v363_v40  ;;  %v499_v44 = vpack.c.bf16 %v362_v41, %v362_v41  ;;  %vm344_vm7 = vcmp.ge.f32.partialorder %v316_v38, 0.0  ;;  %v352_v47 = vmul.f32 0.01, %v316_v38 }
  0xf7   : > { %v366_v45 = vsel %vm350_vm6, %v340_v28, %v358_v37  ;;  %400 = vst.msk [vmem:[%s658_s13] sm:$0xf] %vm399_vm2, %v496_v39  ;;  %vm348_vm8 = vcmp.ge.f32.partialorder %v332_v42, 0.0  ;;  %v356_v48 = vmul.f32 0.01, %v332_v42 }
  0xf8   : > { %v503_v46 = vpack.c.bf16 %v366_v45, %v366_v45  ;;  %404 = vst.msk [vmem:[%s658_s13 + $0x10] sm:$0xf] %vm399_vm2, %v500_v43  ;;  %403 = vst.msk [vmem:[%s658_s13 + $0xc] sm:$0xf] %vm399_vm2, %v499_v44  ;;  %v360_v49 = vsel %vm344_vm7, %v316_v38, %v352_v47 }
  0xf9   : > { %v364_v50 = vsel %vm348_vm8, %v332_v42, %v356_v48  ;;  %v497_v51 = vpack.c.bf16 %v360_v49, %v360_v49 }
  0xfa   : > { %407 = vst.msk [vmem:[%s658_s13 + $0x1c] sm:$0xf] %vm399_vm2, %v503_v46  ;;  %v501_v52 = vpack.c.bf16 %v364_v50, %v364_v50 }
  0xfb   : > { %401 = vst.msk [vmem:[%s658_s13 + $0x4] sm:$0xf] %vm399_vm2, %v497_v51 }
  0xfc   : > { %405 = vst.msk [vmem:[%s658_s13 + $0x14] sm:$0xf] %vm399_vm2, %v501_v52 }
  0xfd PF: > { %s13_s12 = sadd.s32 1, %s582_s12  }
  0xfe   : > { %p10_p4 = scmp.ge.s32.totalorder %s13_s12, 4  }
 0x100   :  { %12 = sbr.rel (!%p10_p4) target bundleno = 1 (0x1), region = 62 }

// kernel: encoder_forward.10
= control target key start
LH: loop header
LB: loop body
LE: loop exit
PB: predicated region body
PF: predicated region fallthrough
CT: control target
= control target key end

     0   :  { %s1919_s12 = smov 0   ;;  %s2272_s0 = inlined_call_operand.vmem [shape: bf16[32,1664], index: 0, kind: input, shape index: {}]   ;;  %s2273_s1 = inlined_call_operand.vmem [shape: bf16[1664,128], index: 1, kind: input, shape index: {}]   ;;  %s2274_s2 = inlined_call_operand.vmem [shape: f32[1,128], index: 2, kind: input, shape index: {}]   ;;  %s2275_s3 = inlined_call_operand.vmem [shape: bf16[32,128], index: 3, kind: output, shape index: {}]  }
   0x1 LB: > { %s1456_s13 = sadd.s32 4294967295, %s1895_s12   ;;  %p1460_p0 = scmp.ge.s32.totalorder %s1895_s12, 1  ;;  %s1895_s12 = sphi %s1919_s12, %s13_s12  }
   0x2   : > { %p139_p1 = scmp.lt.s32.totalorder %s1895_s12, 3 }
   0x4   : > { %p140_p2 = pnand %p1460_p0, %p139_p1 }
   0x5   : > { %s1461_s17 = sshll.u32 (!%p140_p2), %s1456_s13, 1 }
   0x6   : > { %143 = sbr.rel (%p140_p2) target bundleno = 345 (0x159), region = 32  ;;  %p165_p3 = scmp.lt.s32.totalorder (!%p140_p2), %s1461_s17, 3 }
   0xb   : > { %v1766_v0 = vld [vmem:[%s2273_s1 + $0x78] sm:$0xff]   ;;  %v1770_v4 = vld [vmem:[%s2273_s1 + $0x70] sm:$0xff]   ;;  %v1774_v8 = vld [vmem:[%s2273_s1 + $0x68] sm:$0xff]   ;;  %s2277_s17 = smov (!%p165_p3, %s1461_s17), 3  ;;  %vm1898_vm0 = vmmov 0  }
   0xc   : > { %v1767_v1 = vld [vmem:[%s2273_s1 + $0x38] sm:$0xff]   ;;  %1594 = vmatprep.subr.bf16.mxu0 %v1766_v0  ;;  %v1771_v5 = vld [vmem:[%s2273_s1 + $0x30] sm:$0xff]   ;;  %v1775_v9 = vld [vmem:[%s2273_s1 + $0x28] sm:$0xff]   ;;  %s1755_s14 = smul.u32 52, %s2277_s17  ;;  %s1464_s6 = sshll.u32 %s2277_s17, 2 }
   0xd   : > { %v1768_v2 = vld [vmem:[%s2273_s1 + $0xf8] sm:$0xff]   ;;  %1595 = vmatpush3.bf16.msra.mxu0 %v1767_v1  ;;  %v1772_v6 = vld [vmem:[%s2273_s1 + $0xf0] sm:$0xff]   ;;  %v1776_v10 = vld [vmem:[%s2273_s1 + $0xe8] sm:$0xff]   ;;  %s175_s9 = scalar_lea.vmem %s2275_s3, %s1464_s6 }
   0xe   : > { %v1769_v3 = vld [vmem:[%s2273_s1 + $0xb8] sm:$0xff]   ;;  %1616 = vmatprep.subr.bf16.mxu1 %v1768_v2  ;;  %1596 = vmatprep.subr.bf16.mxu0 %v1770_v4  ;;  %v1773_v7 = vld [vmem:[%s2273_s1 + $0xb0] sm:$0xff]   ;;  %v1777_v11 = vld [vmem:[%s2273_s1 + $0xa8] sm:$0xff]   ;;  %s2022_s13 = scalar_lea.vmem %s2272_s0, %s1755_s14 }
   0xf   : > { %1617 = vmatpush3.bf16.msra.mxu1 %v1769_v3  ;;  %v1778_v12 = vld [vmem:[%s2273_s1 + $0x60] sm:$0xff]   ;;  %v1782_v16 = vld [vmem:[%s2273_s1 + $0x58] sm:$0xff]   ;;  %v1786_v20 = vld [vmem:[%s2273_s1 + $0x50] sm:$0xff]  }
  0x10   : > { %1618 = vmatprep.subr.bf16.mxu1 %v1772_v6  ;;  %v1779_v13 = vld [vmem:[%s2273_s1 + $0x20] sm:$0xff]   ;;  %v1783_v17 = vld [vmem:[%s2273_s1 + $0x18] sm:$0xff]   ;;  %v1787_v21 = vld [vmem:[%s2273_s1 + $0x10] sm:$0xff]  }
  0x11   : > { %1597 = vmatpush3.bf16.msra.mxu0 %v1771_v5  ;;  %v1780_v14 = vld [vmem:[%s2273_s1 + $0xe0] sm:$0xff]   ;;  %v1784_v18 = vld [vmem:[%s2273_s1 + $0xd8] sm:$0xff]   ;;  %v1788_v22 = vld [vmem:[%s2273_s1 + $0xd0] sm:$0xff]  }
  0x12   : > { %1598 = vmatprep.subr.bf16.mxu0 %v1774_v8  ;;  %v1781_v15 = vld [vmem:[%s2273_s1 + $0xa0] sm:$0xff]   ;;  %v1785_v19 = vld [vmem:[%s2273_s1 + $0x98] sm:$0xff]   ;;  %v1789_v23 = vld [vmem:[%s2273_s1 + $0x90] sm:$0xff]  }
  0x13   : > { %1619 = vmatpush3.bf16.msra.mxu1 %v1773_v7  ;;  %v1790_v24 = vld [vmem:[%s2273_s1 + $0x48] sm:$0xff]   ;;  %v1794_v28 = vld [vmem:[%s2273_s1 + $0x40] sm:$0xff]   ;;  %v1801_v34 = vld [vmem:[%s2273_s1 + $0x178] sm:$0xff]  }
  0x14   : > { %1620 = vmatprep.subr.bf16.mxu1 %v1776_v10  ;;  %v1791_v25 = vld [vmem:[%s2273_s1 + $0x8] sm:$0xff]   ;;  %v1795_v29 = vld [vmem:[%s2273_s1] sm:$0xff]   ;;  %v1805_v37 = vld [vmem:[%s2273_s1 + $0x138] sm:$0xff]  }
  0x15   : > { %1599 = vmatpush3.bf16.msra.mxu0 %v1775_v9  ;;  %v1792_v26 = vld [vmem:[%s2273_s1 + $0xc8] sm:$0xff]   ;;  %v1796_v30 = vld [vmem:[%s2273_s1 + $0xc0] sm:$0xff]   ;;  %v1806_v38 = vld [vmem:[%s2273_s1 + $0x1f8] sm:$0xff]  }
  0x16   : > { %1600 = vmatprep.subr.bf16.mxu0 %v1778_v12  ;;  %v1793_v27 = vld [vmem:[%s2273_s1 + $0x88] sm:$0xff]   ;;  %v1797_v31 = vld [vmem:[%s2022_s13] ss:$52 sps:$4 sm:$0xff]   ;;  %v1799_v32 = vld [vmem:[%s2022_s13 + $0x4] ss:$52 sps:$4 sm:$0xff]  }
  0x17   : > { %1621 = vmatpush3.bf16.msra.mxu1 %v1777_v11  ;;  %v1800_v33 = vld [vmem:[%s2273_s1 + $0x80] sm:$0xff]   ;;  %1129 = vmatprep.mubr.bf16.mxu0 %v1799_v32  ;;  %v1802_v35 = vld [vmem:[%s2022_s13 + $0x8] ss:$52 sps:$4 sm:$0xff]   ;;  %v1808_v40 = vld [vmem:[%s2273_s1 + $0x170] sm:$0xff]  }
  0x18   : > { %1622 = vmatprep.subr.bf16.mxu1 %v1780_v14  ;;  %v1804_v36 = vld [vmem:[%s2022_s13 + $0xc] ss:$52 sps:$4 sm:$0xff]   ;;  %v1807_v39 = vld [vmem:[%s2273_s1 + $0x1b8] sm:$0xff]   ;;  %v1809_v41 = vld [vmem:[%s2273_s1 + $0x130] sm:$0xff]  }
  0x19   : > { %1601 = vmatpush3.bf16.msra.mxu0 %v1779_v13  ;;  %1170 = vmatprep.mubr.bf16.mxu1 %v1804_v36  ;;  %v1810_v42 = vld [vmem:[%s2273_s1 + $0x1f0] sm:$0xff]   ;;  %v1812_v44 = vld [vmem:[%s2273_s1 + $0x168] sm:$0xff]   ;;  %v1816_v48 = vld [vmem:[%s2273_s1 + $0x160] sm:$0xff]  }
  0x1a   : > { %1602 = vmatprep.subr.bf16.mxu0 %v1782_v16  ;;  %v1811_v43 = vld [vmem:[%s2273_s1 + $0x1b0] sm:$0xff]   ;;  %v1813_v45 = vld [vmem:[%s2273_s1 + $0x128] sm:$0xff]   ;;  %v1817_v49 = vld [vmem:[%s2273_s1 + $0x120] sm:$0xff]  }
  0x1b   : > { %1623 = vmatpush3.bf16.msra.mxu1 %v1781_v15  ;;  %v1814_v46 = vld [vmem:[%s2273_s1 + $0x1e8] sm:$0xff]   ;;  %v1818_v50 = vld [vmem:[%s2273_s1 + $0x1e0] sm:$0xff]   ;;  %v1820_v52 = vld [vmem:[%s2273_s1 + $0x158] sm:$0xff]  }
  0x1c   : > { %1624 = vmatprep.subr.bf16.mxu1 %v1784_v18  ;;  %v1815_v47 = vld [vmem:[%s2273_s1 + $0x1a8] sm:$0xff]   ;;  %v1819_v51 = vld [vmem:[%s2273_s1 + $0x1a0] sm:$0xff]   ;;  %v1821_v53 = vld [vmem:[%s2273_s1 + $0x118] sm:$0xff]  }
  0x1d   : > { %1603 = vmatpush3.bf16.msra.mxu0 %v1783_v17  ;;  %v1822_v54 = vld [vmem:[%s2273_s1 + $0x1d8] sm:$0xff]   ;;  %v1824_v56 = vld [vmem:[%s2273_s1 + $0x150] sm:$0xff]   ;;  %v1828_v60 = vld [vmem:[%s2273_s1 + $0x148] sm:$0xff]  }
  0x1e   : > { %1604 = vmatprep.subr.bf16.mxu0 %v1786_v20  ;;  %v1823_v55 = vld [vmem:[%s2273_s1 + $0x198] sm:$0xff]   ;;  %v1825_v57 = vld [vmem:[%s2273_s1 + $0x110] sm:$0xff]   ;;  %v1829_v61 = vld [vmem:[%s2273_s1 + $0x108] sm:$0xff]  }
  0x1f   : > { %1625 = vmatpush3.bf16.msra.mxu1 %v1785_v19  ;;  %v1826_v58 = vld [vmem:[%s2273_s1 + $0x1d0] sm:$0xff]   ;;  %v1830_v62 = vld [vmem:[%s2273_s1 + $0x1c8] sm:$0xff]   ;;  %v1832_v0 = vld [vmem:[%s2273_s1 + $0x140] sm:$0xff]  }
  0x20   : > { %1626 = vmatprep.subr.bf16.mxu1 %v1788_v22  ;;  %v1827_v59 = vld [vmem:[%s2273_s1 + $0x190] sm:$0xff]   ;;  %v1831_v63 = vld [vmem:[%s2273_s1 + $0x188] sm:$0xff]   ;;  %v1833_v1 = vld [vmem:[%s2273_s1 + $0x100] sm:$0xff]  }
  0x21   : > { %1605 = vmatpush3.bf16.msra.mxu0 %v1787_v21  ;;  %v1834_v2 = vld [vmem:[%s2273_s1 + $0x1c0] sm:$0xff]   ;;  %v1837_v4 = vld [vmem:[%s2022_s13 + $0x14] ss:$52 sps:$4 sm:$0xff]   ;;  %v1839_v6 = vld [vmem:[%s2273_s1 + $0x278] sm:$0xff]  }
  0x22   : > { %1606 = vmatprep.subr.bf16.mxu0 %v1790_v24  ;;  %v1835_v3 = vld [vmem:[%s2022_s13 + $0x10] ss:$52 sps:$4 sm:$0xff]   ;;  %v1840_v7 = vld [vmem:[%s2022_s13 + $0x18] ss:$52 sps:$4 sm:$0xff]  }
  0x23   : > { %1627 = vmatpush3.bf16.msra.mxu1 %v1789_v23  ;;  %v1838_v5 = vld [vmem:[%s2273_s1 + $0x180] sm:$0xff]   ;;  %v1842_v8 = vld [vmem:[%s2022_s13 + $0x1c] ss:$52 sps:$4 sm:$0xff]   ;;  %v1850_v16 = vld [vmem:[%s2273_s1 + $0x268] sm:$0xff]  }
  0x24   : > { %1628 = vmatprep.subr.bf16.mxu1 %v1792_v26  ;;  %v1843_v9 = vld [vmem:[%s2273_s1 + $0x238] sm:$0xff]   ;;  %v1846_v12 = vld [vmem:[%s2273_s1 + $0x270] sm:$0xff]   ;;  %v1851_v17 = vld [vmem:[%s2273_s1 + $0x228] sm:$0xff]  }
  0x25   : > { %1607 = vmatpush3.bf16.msra.mxu0 %v1791_v25  ;;  %v1844_v10 = vld [vmem:[%s2273_s1 + $0x2f8] sm:$0xff]   ;;  %v1847_v13 = vld [vmem:[%s2273_s1 + $0x230] sm:$0xff]   ;;  %v1852_v18 = vld [vmem:[%s2273_s1 + $0x2e8] sm:$0xff]  }
  0x26   : > { %1608 = vmatprep.subr.bf16.mxu0 %v1794_v28  ;;  %v1845_v11 = vld [vmem:[%s2273_s1 + $0x2b8] sm:$0xff]   ;;  %v1848_v14 = vld [vmem:[%s2273_s1 + $0x2f0] sm:$0xff]   ;;  %v1853_v19 = vld [vmem:[%s2273_s1 + $0x2a8] sm:$0xff]  }
  0x27   : > { %1629 = vmatpush3.bf16.msra.mxu1 %v1793_v27  ;;  %v1849_v15 = vld [vmem:[%s2273_s1 + $0x2b0] sm:$0xff]   ;;  %v1854_v20 = vld [vmem:[%s2273_s1 + $0x260] sm:$0xff]   ;;  %v1858_v24 = vld [vmem:[%s2273_s1 + $0x258] sm:$0xff]  }
  0x28   : > { %1630 = vmatprep.subr.bf16.mxu1 %v1796_v30  ;;  %v1855_v21 = vld [vmem:[%s2273_s1 + $0x220] sm:$0xff]   ;;  %v1859_v25 = vld [vmem:[%s2273_s1 + $0x218] sm:$0xff]   ;;  %v1862_v28 = vld [vmem:[%s2273_s1 + $0x250] sm:$0xff]  }
  0x29   : > { %1609 = vmatpush3.bf16.msra.mxu0 %v1795_v29  ;;  %v1856_v22 = vld [vmem:[%s2273_s1 + $0x2e0] sm:$0xff]   ;;  %v1860_v26 = vld [vmem:[%s2273_s1 + $0x2d8] sm:$0xff]   ;;  %v1863_v29 = vld [vmem:[%s2273_s1 + $0x210] sm:$0xff]  }
  0x2a   : > { %1638 = vmatprep.subr.bf16.mxu0 %v1801_v34  ;;  %v1857_v23 = vld [vmem:[%s2273_s1 + $0x2a0] sm:$0xff]   ;;  %v1861_v27 = vld [vmem:[%s2273_s1 + $0x298] sm:$0xff]   ;;  %v1864_v30 = vld [vmem:[%s2273_s1 + $0x2d0] sm:$0xff]  }
  0x2b   : > { %1631 = vmatpush3.bf16.msra.mxu1 %v1800_v33  ;;  %v1866_v32 = vld [vmem:[%s2273_s1 + $0x248] sm:$0xff]   ;;  %v1870_v36 = vld [vmem:[%s2273_s1 + $0x240] sm:$0xff]  }
  0x2c   : > { %1130 = vmatmul.mubr.bf16.vlgmr.msra.gmra.mxu0 %v1797_v31  ;;  %1660 = vmatprep.subr.bf16.mxu1 %v1806_v38  ;;  %v1865_v31 = vld [vmem:[%s2273_s1 + $0x290] sm:$0xff]   ;;  %v1867_v33 = vld [vmem:[%s2273_s1 + $0x208] sm:$0xff]   ;;  %v1872_v38 = vld [vmem:[%s2273_s1 + $0x2c0] sm:$0xff]  }
  0x2d   : > { %1639 = vmatpush3.bf16.msra.mxu0 %v1805_v37  ;;  %1211 = vmatprep.mubr.bf16.mxu0 %v1837_v4  ;;  %v1868_v34 = vld [vmem:[%s2273_s1 + $0x2c8] sm:$0xff]   ;;  %v1871_v37 = vld [vmem:[%s2273_s1 + $0x200] sm:$0xff]  }
  0x2e   : > { %1171 = vmatmul.mubr.bf16.vlgmr.msra.gmra.mxu1 %v1802_v35  ;;  %1640 = vmatprep.subr.bf16.mxu0 %v1808_v40  ;;  %v1869_v35 = vld [vmem:[%s2273_s1 + $0x288] sm:$0xff]   ;;  %v1875_v40 = vld [vmem:[%s2022_s13 + $0x24] ss:$52 sps:$4 sm:$0xff]  }
  0x2f   : > { %1661 = vmatpush3.bf16.msra.mxu1 %v1807_v39  ;;  %1252 = vmatprep.mubr.bf16.mxu1 %v1842_v8  ;;  %v1873_v39 = vld [vmem:[%s2022_s13 + $0x20] ss:$52 sps:$4 sm:$0xff]  }
  0x30   : > { %1662 = vmatprep.subr.bf16.mxu1 %v1810_v42  ;;  %v1897_v42 = vmov 0.0  }
  0x31   : > { %1641 = vmatpush3.bf16.msra.mxu0 %v1809_v41  ;;  %v1876_v41 = vld [vmem:[%s2273_s1 + $0x280] sm:$0xff]  }
  0x32   : > { %1642 = vmatprep.subr.bf16.mxu0 %v1812_v44  ;;  %v1879_v44 = vld [vmem:[%s2022_s13 + $0x2c] ss:$52 sps:$4 sm:$0xff]  }
  0x33   : > { %1663 = vmatpush3.bf16.msra.mxu1 %v1811_v43  ;;  %v1877_v43 = vld [vmem:[%s2022_s13 + $0x28] ss:$52 sps:$4 sm:$0xff]  }
  0x34   : > { %1664 = vmatprep.subr.bf16.mxu1 %v1814_v46  ;;  %v1881_v46 = vld [vmem:[%s2273_s1 + $0x330] sm:$0xff]  }
  0x35   : > { %1643 = vmatpush3.bf16.msra.mxu0 %v1813_v45  ;;  %v1880_v45 = vld [vmem:[%s2273_s1 + $0x338] sm:$0xff]  }
  0x36   : > { %1644 = vmatprep.subr.bf16.mxu0 %v1816_v48  ;;  %v1883_v48 = vld [vmem:[%s2273_s1 + $0x320] sm:$0xff]  }
  0x37   : > { %1665 = vmatpush3.bf16.msra.mxu1 %v1815_v47  ;;  %v1882_v47 = vld [vmem:[%s2273_s1 + $0x328] sm:$0xff]  }
  0x38   : > { %1666 = vmatprep.subr.bf16.mxu1 %v1818_v50  ;;  %v1885_v50 = vld [vmem:[%s2273_s1 + $0x310] sm:$0xff]  }
  0x39   : > { %1645 = vmatpush3.bf16.msra.mxu0 %v1817_v49  ;;  %v1884_v49 = vld [vmem:[%s2273_s1 + $0x318] sm:$0xff]  }
  0x3a   : > { %1646 = vmatprep.subr.bf16.mxu0 %v1820_v52  ;;  %v1887_v52 = vld [vmem:[%s2273_s1 + $0x300] sm:$0xff]  }
  0x3b   : > { %1667 = vmatpush3.bf16.msra.mxu1 %v1819_v51  ;;  %v1886_v51 = vld [vmem:[%s2273_s1 + $0x308] sm:$0xff]  }
  0x3c   : > { %1668 = vmatprep.subr.bf16.mxu1 %v1822_v54 }
  0x3d   : > { %1647 = vmatpush3.bf16.msra.mxu0 %v1821_v53  ;;  %v1888_v53 = vld [vmem:[%s2022_s13 + $0x30] ss:$52 sps:$4 sm:$0xff]  }
  0x3e   : > { %1648 = vmatprep.subr.bf16.mxu0 %v1824_v56 }
  0x3f   : > { %1669 = vmatpush3.bf16.msra.mxu1 %v1823_v55 }
  0x40   : > { %1670 = vmatprep.subr.bf16.mxu1 %v1826_v58 }
  0x41   : > { %1649 = vmatpush3.bf16.msra.mxu0 %v1825_v57 }
  0x42   : > { %1650 = vmatprep.subr.bf16.mxu0 %v1828_v60 }
  0x43   : > { %1671 = vmatpush3.bf16.msra.mxu1 %v1827_v59 }
  0x44   : > { %1672 = vmatprep.subr.bf16.mxu1 %v1830_v62 }
  0x45   : > { %1651 = vmatpush3.bf16.msra.mxu0 %v1829_v61 }
  0x46   : > { %1652 = vmatprep.subr.bf16.mxu0 %v1832_v0 }
  0x47   : > { %1673 = vmatpush3.bf16.msra.mxu1 %v1831_v63 }
  0x48   : > { %1674 = vmatprep.subr.bf16.mxu1 %v1834_v2 }
  0x49   : > { %1653 = vmatpush3.bf16.msra.mxu0 %v1833_v1 }
  0x4a   : > { %1682 = vmatprep.subr.bf16.mxu0 %v1839_v6  ;;  %v1465_v6 = vld [vmem:[%s2274_s2] ss:$0 sm:$0xff] }
  0x4b   : > { %1675 = vmatpush3.bf16.msra.mxu1 %v1838_v5 }
  0x4c   : > { %1212 = vmatmul.mubr.bf16.vlgmr.msra.gmra.mxu0 %v1835_v3  ;;  %1704 = vmatprep.subr.bf16.mxu1 %v1844_v10 }
  0x4d   : > { %1683 = vmatpush3.bf16.msra.mxu0 %v1843_v9  ;;  %1293 = vmatprep.mubr.bf16.mxu0 %v1875_v40 }
  0x4e   : > { %1253 = vmatmul.mubr.bf16.vlgmr.msra.gmra.mxu1 %v1840_v7  ;;  %1684 = vmatprep.subr.bf16.mxu0 %v1846_v12 }
  0x4f   : > { %1705 = vmatpush3.bf16.msra.mxu1 %v1845_v11  ;;  %1334 = vmatprep.mubr.bf16.mxu1 %v1879_v44 }
  0x50   : > { %1706 = vmatprep.subr.bf16.mxu1 %v1848_v14 }
  0x51   : > { %1685 = vmatpush3.bf16.msra.mxu0 %v1847_v13 }
  0x52   : > { %1686 = vmatprep.subr.bf16.mxu0 %v1850_v16 }
  0x53   : > { %1707 = vmatpush3.bf16.msra.mxu1 %v1849_v15 }
  0x54   : > { %1708 = vmatprep.subr.bf16.mxu1 %v1852_v18 }
  0x55   : > { %1687 = vmatpush3.bf16.msra.mxu0 %v1851_v17 }
  0x56   : > { %1688 = vmatprep.subr.bf16.mxu0 %v1854_v20 }
  0x57   : > { %1709 = vmatpush3.bf16.msra.mxu1 %v1853_v19 }
  0x58   : > { %1710 = vmatprep.subr.bf16.mxu1 %v1856_v22 }
  0x59   : > { %1689 = vmatpush3.bf16.msra.mxu0 %v1855_v21 }
  0x5a   : > { %1690 = vmatprep.subr.bf16.mxu0 %v1858_v24 }
  0x5b   : > { %1711 = vmatpush3.bf16.msra.mxu1 %v1857_v23 }
  0x5c   : > { %1712 = vmatprep.subr.bf16.mxu1 %v1860_v26 }
  0x5d   : > { %1691 = vmatpush3.bf16.msra.mxu0 %v1859_v25 }
  0x5e   : > { %1692 = vmatprep.subr.bf16.mxu0 %v1862_v28 }
  0x5f   : > { %1713 = vmatpush3.bf16.msra.mxu1 %v1861_v27 }
  0x60   : > { %1714 = vmatprep.subr.bf16.mxu1 %v1864_v30 }
  0x61   : > { %1693 = vmatpush3.bf16.msra.mxu0 %v1863_v29 }
  0x62   : > { %1694 = vmatprep.subr.bf16.mxu0 %v1866_v32 }
  0x63   : > { %1715 = vmatpush3.bf16.msra.mxu1 %v1865_v31 }
  0x64   : > { %1716 = vmatprep.subr.bf16.mxu1 %v1868_v34 }
  0x65   : > { %1695 = vmatpush3.bf16.msra.mxu0 %v1867_v33 }
  0x66   : > { %1696 = vmatprep.subr.bf16.mxu0 %v1870_v36 }
  0x67   : > { %1717 = vmatpush3.bf16.msra.mxu1 %v1869_v35 }
  0x68   : > { %1718 = vmatprep.subr.bf16.mxu1 %v1872_v38 }
  0x69   : > { %1697 = vmatpush3.bf16.msra.mxu0 %v1871_v37 }
  0x6a   : > { %1735 = vmatprep.subr.bf16.mxu0 %v1897_v42 }
  0x6b   : > { %1719 = vmatpush3.bf16.msra.mxu1 %v1876_v41 }
  0x6c   : > { %1294 = vmatmul.mubr.bf16.vlgmr.msra.gmra.mxu0 %v1873_v39 }
  0x6d   : > { %1751 = vmatprep.mubr.msk.bf16.mxu0 %vm1898_vm0, %v1897_v42  ;;  %1736 = vmatpush3.bf16.msra.mxu0 %v1880_v45 }
  0x6e   : > { %1335 = vmatmul.mubr.bf16.vlgmr.msra.gmra.mxu1 %v1877_v43  ;;  %1737 = vmatprep.subr.bf16.mxu0 %v1897_v42 }
  0x71   : > { %1738 = vmatpush3.bf16.msra.mxu0 %v1881_v46 }
  0x72   : > { %1739 = vmatprep.subr.bf16.mxu0 %v1897_v42 }
  0x75   : > { %1740 = vmatpush3.bf16.msra.mxu0 %v1882_v47 }
  0x76   : > { %1741 = vmatprep.subr.bf16.mxu0 %v1897_v42 }
  0x79   : > { %1742 = vmatpush3.bf16.msra.mxu0 %v1883_v48 }
  0x7a   : > { %1743 = vmatprep.subr.bf16.mxu0 %v1897_v42 }
  0x7d   : > { %1744 = vmatpush3.bf16.msra.mxu0 %v1884_v49 }
  0x7e   : > { %1745 = vmatprep.subr.bf16.mxu0 %v1897_v42 }
  0x81   : > { %1746 = vmatpush3.bf16.msra.mxu0 %v1885_v50 }
  0x82   : > { %1747 = vmatprep.subr.bf16.mxu0 %v1897_v42 }
  0x85   : > { %1748 = vmatpush3.bf16.msra.mxu0 %v1886_v51 }
  0x86   : > { %1749 = vmatprep.subr.bf16.mxu0 %v1897_v42 }
  0x89   : > { %1750 = vmatpush3.bf16.msra.mxu0 %v1887_v52 }
  0x8c   : > { %1752 = vmatmul.mubr.bf16.vlgmr.msra.gmra.mxu0 %v1888_v53 }
  0xec   : > { %v1610_v54 = vpop.f32.mrf.mxu0 }
  0xee   : > { %v1611_v55 = vpop.f32.mrf.mxu0  ;;  %v1632_v56 = vpop.f32.mrf.mxu1 }
  0xef   : > { %v1612_v5 = vadd.f32 %v1611_v55, %v1610_v54 }
  0xf0   : > { %v1613_v57 = vpop.f32.mrf.mxu0  ;;  %v1633_v58 = vpop.f32.mrf.mxu1 }
  0xf1   : > { %v1132_v9 = vadd.f32 %v1612_v5, %v1465_v6  ;;  %v1634_v10 = vadd.f32 %v1633_v58, %v1632_v56 }
  0xf2   : > { %v1614_v59 = vpop.f32.mrf.mxu0  ;;  %v1635_v60 = vpop.f32.mrf.mxu1 }
  0xf3   : > { %v1615_v11 = vadd.f32 %v1614_v59, %v1613_v57  ;;  %v1173_v15 = vadd.f32 %v1634_v10, %v1132_v9 }
  0xf4   : > { %v1636_v62 = vpop.f32.mrf.mxu1 }
  0xf5   : > { %v1135_v16 = vadd.f32 %v1615_v11, %v1465_v6  ;;  %v1637_v17 = vadd.f32 %v1636_v62, %v1635_v60 }
  0xf7   : > { %v1176_v23 = vadd.f32 %v1637_v17, %v1135_v16 }
 0x10c   : > { %v1654_v61 = vpop.f32.mrf.mxu0 }
 0x10e   : > { %v1655_v63 = vpop.f32.mrf.mxu0  ;;  %v1676_v0 = vpop.f32.mrf.mxu1 }
 0x10f   : > { %v1656_v14 = vadd.f32 %v1655_v63, %v1654_v61 }
 0x110   : > { %v1657_v1 = vpop.f32.mrf.mxu0  ;;  %v1677_v2 = vpop.f32.mrf.mxu1 }
 0x111   : > { %v1214_v20 = vadd.f32 %v1656_v14, %v1173_v15  ;;  %v1678_v21 = vadd.f32 %v1677_v2, %v1676_v0 }
 0x112   : > { %v1658_v3 = vpop.f32.mrf.mxu0  ;;  %v1679_v4 = vpop.f32.mrf.mxu1 }
 0x113   : > { %v1659_v22 = vadd.f32 %v1658_v3, %v1657_v1  ;;  %v1255_v27 = vadd.f32 %v1678_v21, %v1214_v20 }
 0x114   : > { %v1680_v8 = vpop.f32.mrf.mxu1 }
 0x115   : > { %v1217_v28 = vadd.f32 %v1659_v22, %v1176_v23  ;;  %v1681_v29 = vadd.f32 %v1680_v8, %v1679_v4 }
 0x117   : > { %v1258_v34 = vadd.f32 %v1681_v29, %v1217_v28 }
 0x12c   : > { %v1698_v7 = vpop.f32.mrf.mxu0 }
 0x12e   : > { %v1699_v12 = vpop.f32.mrf.mxu0  ;;  %v1720_v13 = vpop.f32.mrf.mxu1 }
 0x12f   : > { %v1700_v24 = vadd.f32 %v1699_v12, %v1698_v7 }
 0x130   : > { %v1701_v18 = vpop.f32.mrf.mxu0  ;;  %v1721_v19 = vpop.f32.mrf.mxu1 }
 0x131   : > { %v1296_v30 = vadd.f32 %v1700_v24, %v1255_v27  ;;  %v1722_v31 = vadd.f32 %v1721_v19, %v1720_v13 }
 0x132   : > { %v1702_v25 = vpop.f32.mrf.mxu0  ;;  %v1723_v26 = vpop.f32.mrf.mxu1 }
 0x133   : > { %v1703_v32 = vadd.f32 %v1702_v25, %v1701_v18  ;;  %v1337_v37 = vadd.f32 %v1722_v31, %v1296_v30 }
 0x134   : > { %v1724_v33 = vpop.f32.mrf.mxu1 }
 0x135   : > { %v1299_v35 = vadd.f32 %v1703_v32, %v1258_v34  ;;  %v1725_v36 = vadd.f32 %v1724_v33, %v1723_v26 }
 0x137   : > { %v1340_v41 = vadd.f32 %v1725_v36, %v1299_v35 }
 0x14c   : > { %v1377_v38 = vpop.f32.mrf.mxu0 }
 0x14d   : > { %v1378_v39 = vadd.f32 %v1377_v38, %v1337_v37 }
 0x14e   : > { %v1753_v40 = vpop.f32.mrf.mxu0 }
 0x14f   : > { %v1386_v43 = vmul.f32 0.01, %v1378_v39  ;;  %vm1384_vm1 = vcmp.ge.f32.partialorder %v1378_v39, 0.0 }
 0x150   : > { %v1380_v42 = vpop.f32.mrf.mxu0 }
 0x151   : > { %v1381_v44 = vadd.f32 %v1380_v42, %v1340_v41  ;;  %v1388_v47 = vsel %vm1384_vm1, %v1378_v39, %v1386_v43 }
 0x152   : > { %v1754_v45 = vpop.f32.mrf.mxu0 }
 0x153   : > { %vm1385_vm2 = vcmp.ge.f32.partialorder %v1381_v44, 0.0  ;;  %v1387_v46 = vmul.f32 0.01, %v1381_v44 }
 0x155   : > { %v1389_v48 = vsel %vm1385_vm2, %v1381_v44, %v1387_v46 }
 0x156   : > { %v1592_v49 = vpack.c.bf16 %v1389_v48, %v1388_v47 }
 0x158   : > { %1593 = vst [vmem:[%s175_s9] sm:$0xff] %v1592_v49  }
 0x159 PF: > { %s13_s12 = sadd.s32 1, %s1895_s12  }
 0x15a   : > { %p10_p4 = scmp.ge.s32.totalorder %s13_s12, 4  }
 0x15c   :  { %12 = sbr.rel (!%p10_p4) target bundleno = 1 (0x1), region = 62 }

// kernel: encoder_forward.11
= control target key start
LH: loop header
LB: loop body
LE: loop exit
PB: predicated region body
PF: predicated region fallthrough
CT: control target
= control target key end

     0   :  { %s1439_s12 = smov 0   ;;  %s1692_s0 = inlined_call_operand.vmem [shape: bf16[32,1152], index: 0, kind: input, shape index: {}]   ;;  %s1693_s1 = inlined_call_operand.vmem [shape: bf16[1152,128], index: 1, kind: input, shape index: {}]   ;;  %s1694_s2 = inlined_call_operand.vmem [shape: f32[1,128], index: 2, kind: input, shape index: {}]   ;;  %s1695_s3 = inlined_call_operand.vmem [shape: bf16[32,128], index: 3, kind: output, shape index: {}]  }
   0x1 LB: > { %s1094_s13 = sadd.s32 4294967295, %s1415_s12   ;;  %p1098_p0 = scmp.ge.s32.totalorder %s1415_s12, 1  ;;  %s1415_s12 = sphi %s1439_s12, %s13_s12  }
   0x2   : > { %p139_p1 = scmp.lt.s32.totalorder %s1415_s12, 3 }
   0x4   : > { %p140_p2 = pnand %p1098_p0, %p139_p1 }
   0x5   : > { %s1099_s17 = sshll.u32 (!%p140_p2), %s1094_s13, 1 }
   0x6   : > { %143 = sbr.rel (%p140_p2) target bundleno = 313 (0x139), region = 32  ;;  %p165_p3 = scmp.lt.s32.totalorder (!%p140_p2), %s1099_s17, 3 }
   0xb   : > { %v1324_v0 = vld [vmem:[%s1693_s1 + $0x78] sm:$0xff]   ;;  %v1328_v4 = vld [vmem:[%s1693_s1 + $0x70] sm:$0xff]   ;;  %v1332_v8 = vld [vmem:[%s1693_s1 + $0x68] sm:$0xff]   ;;  %s1697_s17 = smov (!%p165_p3, %s1099_s17), 3  ;;  %vm1418_vm0 = vmmov 0  }
   0xc   : > { %v1325_v1 = vld [vmem:[%s1693_s1 + $0x38] sm:$0xff]   ;;  %1196 = vmatprep.subr.bf16.mxu0 %v1324_v0  ;;  %v1329_v5 = vld [vmem:[%s1693_s1 + $0x30] sm:$0xff]   ;;  %v1333_v9 = vld [vmem:[%s1693_s1 + $0x28] sm:$0xff]   ;;  %s1313_s14 = smul.u32 36, %s1697_s17 }
   0xd   : > { %v1326_v2 = vld [vmem:[%s1693_s1 + $0xf8] sm:$0xff]   ;;  %1197 = vmatpush3.bf16.msra.mxu0 %v1325_v1  ;;  %v1330_v6 = vld [vmem:[%s1693_s1 + $0xf0] sm:$0xff]   ;;  %v1334_v10 = vld [vmem:[%s1693_s1 + $0xe8] sm:$0xff]  }
   0xe   : > { %v1327_v3 = vld [vmem:[%s1693_s1 + $0xb8] sm:$0xff]   ;;  %1218 = vmatprep.subr.bf16.mxu1 %v1326_v2  ;;  %1198 = vmatprep.subr.bf16.mxu0 %v1328_v4  ;;  %v1331_v7 = vld [vmem:[%s1693_s1 + $0xb0] sm:$0xff]   ;;  %v1335_v11 = vld [vmem:[%s1693_s1 + $0xa8] sm:$0xff]   ;;  %s1542_s13 = scalar_lea.vmem %s1692_s0, %s1313_s14 }
   0xf   : > { %1219 = vmatpush3.bf16.msra.mxu1 %v1327_v3  ;;  %v1336_v12 = vld [vmem:[%s1693_s1 + $0x60] sm:$0xff]   ;;  %v1340_v16 = vld [vmem:[%s1693_s1 + $0x58] sm:$0xff]   ;;  %v1344_v20 = vld [vmem:[%s1693_s1 + $0x50] sm:$0xff]  }
  0x10   : > { %1220 = vmatprep.subr.bf16.mxu1 %v1330_v6  ;;  %v1337_v13 = vld [vmem:[%s1693_s1 + $0x20] sm:$0xff]   ;;  %v1341_v17 = vld [vmem:[%s1693_s1 + $0x18] sm:$0xff]   ;;  %v1345_v21 = vld [vmem:[%s1693_s1 + $0x10] sm:$0xff]   ;;  %v1417_v6 = vmov 0.0  }
  0x11   : > { %1199 = vmatpush3.bf16.msra.mxu0 %v1329_v5  ;;  %v1338_v14 = vld [vmem:[%s1693_s1 + $0xe0] sm:$0xff]   ;;  %v1342_v18 = vld [vmem:[%s1693_s1 + $0xd8] sm:$0xff]   ;;  %v1346_v22 = vld [vmem:[%s1693_s1 + $0xd0] sm:$0xff]  }
  0x12   : > { %1200 = vmatprep.subr.bf16.mxu0 %v1332_v8  ;;  %v1339_v15 = vld [vmem:[%s1693_s1 + $0xa0] sm:$0xff]   ;;  %v1343_v19 = vld [vmem:[%s1693_s1 + $0x98] sm:$0xff]   ;;  %v1347_v23 = vld [vmem:[%s1693_s1 + $0x90] sm:$0xff]  }
  0x13   : > { %1221 = vmatpush3.bf16.msra.mxu1 %v1331_v7  ;;  %v1348_v24 = vld [vmem:[%s1693_s1 + $0x48] sm:$0xff]   ;;  %v1352_v28 = vld [vmem:[%s1693_s1 + $0x40] sm:$0xff]   ;;  %v1359_v34 = vld [vmem:[%s1693_s1 + $0x178] sm:$0xff]  }
  0x14   : > { %1222 = vmatprep.subr.bf16.mxu1 %v1334_v10  ;;  %v1349_v25 = vld [vmem:[%s1693_s1 + $0x8] sm:$0xff]   ;;  %v1353_v29 = vld [vmem:[%s1693_s1] sm:$0xff]   ;;  %v1363_v37 = vld [vmem:[%s1693_s1 + $0x138] sm:$0xff]  }
  0x15   : > { %1201 = vmatpush3.bf16.msra.mxu0 %v1333_v9  ;;  %v1350_v26 = vld [vmem:[%s1693_s1 + $0xc8] sm:$0xff]   ;;  %v1354_v30 = vld [vmem:[%s1693_s1 + $0xc0] sm:$0xff]   ;;  %v1364_v38 = vld [vmem:[%s1693_s1 + $0x1f8] sm:$0xff]  }
  0x16   : > { %1202 = vmatprep.subr.bf16.mxu0 %v1336_v12  ;;  %v1351_v27 = vld [vmem:[%s1693_s1 + $0x88] sm:$0xff]   ;;  %v1355_v31 = vld [vmem:[%s1542_s13] ss:$36 sps:$4 sm:$0xff]   ;;  %v1365_v39 = vld [vmem:[%s1693_s1 + $0x1b8] sm:$0xff]  }
  0x17   : > { %1223 = vmatpush3.bf16.msra.mxu1 %v1335_v11  ;;  %v1357_v32 = vld [vmem:[%s1542_s13 + $0x4] ss:$36 sps:$4 sm:$0xff]   ;;  %v1362_v36 = vld [vmem:[%s1542_s13 + $0xc] ss:$36 sps:$4 sm:$0xff]   ;;  %v1378_v52 = vld [vmem:[%s1693_s1 + $0x158] sm:$0xff]  }
  0x18   : > { %1224 = vmatprep.subr.bf16.mxu1 %v1338_v14  ;;  %v1358_v33 = vld [vmem:[%s1693_s1 + $0x80] sm:$0xff]   ;;  %849 = vmatprep.mubr.bf16.mxu0 %v1357_v32  ;;  %v1360_v35 = vld [vmem:[%s1542_s13 + $0x8] ss:$36 sps:$4 sm:$0xff]   ;;  %v1366_v40 = vld [vmem:[%s1693_s1 + $0x170] sm:$0xff]  }
  0x19   : > { %1203 = vmatpush3.bf16.msra.mxu0 %v1337_v13  ;;  %890 = vmatprep.mubr.bf16.mxu1 %v1362_v36  ;;  %v1367_v41 = vld [vmem:[%s1693_s1 + $0x130] sm:$0xff]   ;;  %v1370_v44 = vld [vmem:[%s1693_s1 + $0x168] sm:$0xff]   ;;  %v1374_v48 = vld [vmem:[%s1693_s1 + $0x160] sm:$0xff]  }
  0x1a   : > { %1204 = vmatprep.subr.bf16.mxu0 %v1340_v16  ;;  %v1368_v42 = vld [vmem:[%s1693_s1 + $0x1f0] sm:$0xff]   ;;  %v1371_v45 = vld [vmem:[%s1693_s1 + $0x128] sm:$0xff]   ;;  %v1375_v49 = vld [vmem:[%s1693_s1 + $0x120] sm:$0xff]  }
  0x1b   : > { %1225 = vmatpush3.bf16.msra.mxu1 %v1339_v15  ;;  %v1369_v43 = vld [vmem:[%s1693_s1 + $0x1b0] sm:$0xff]   ;;  %v1372_v46 = vld [vmem:[%s1693_s1 + $0x1e8] sm:$0xff]   ;;  %v1376_v50 = vld [vmem:[%s1693_s1 + $0x1e0] sm:$0xff]  }
  0x1c   : > { %1226 = vmatprep.subr.bf16.mxu1 %v1342_v18  ;;  %v1373_v47 = vld [vmem:[%s1693_s1 + $0x1a8] sm:$0xff]   ;;  %v1377_v51 = vld [vmem:[%s1693_s1 + $0x1a0] sm:$0xff]   ;;  %v1379_v53 = vld [vmem:[%s1693_s1 + $0x118] sm:$0xff]  }
  0x1d   : > { %1205 = vmatpush3.bf16.msra.mxu0 %v1341_v17  ;;  %v1380_v54 = vld [vmem:[%s1693_s1 + $0x1d8] sm:$0xff]   ;;  %v1382_v56 = vld [vmem:[%s1693_s1 + $0x150] sm:$0xff]   ;;  %v1386_v60 = vld [vmem:[%s1693_s1 + $0x148] sm:$0xff]  }
  0x1e   : > { %1206 = vmatprep.subr.bf16.mxu0 %v1344_v20  ;;  %v1381_v55 = vld [vmem:[%s1693_s1 + $0x198] sm:$0xff]   ;;  %v1383_v57 = vld [vmem:[%s1693_s1 + $0x110] sm:$0xff]   ;;  %v1387_v61 = vld [vmem:[%s1693_s1 + $0x108] sm:$0xff]  }
  0x1f   : > { %1227 = vmatpush3.bf16.msra.mxu1 %v1343_v19  ;;  %v1384_v58 = vld [vmem:[%s1693_s1 + $0x1d0] sm:$0xff]   ;;  %v1388_v62 = vld [vmem:[%s1693_s1 + $0x1c8] sm:$0xff]   ;;  %v1390_v0 = vld [vmem:[%s1693_s1 + $0x140] sm:$0xff]  }
  0x20   : > { %1228 = vmatprep.subr.bf16.mxu1 %v1346_v22  ;;  %v1385_v59 = vld [vmem:[%s1693_s1 + $0x190] sm:$0xff]   ;;  %v1389_v63 = vld [vmem:[%s1693_s1 + $0x188] sm:$0xff]   ;;  %v1391_v1 = vld [vmem:[%s1693_s1 + $0x100] sm:$0xff]  }
  0x21   : > { %1207 = vmatpush3.bf16.msra.mxu0 %v1345_v21  ;;  %v1392_v2 = vld [vmem:[%s1693_s1 + $0x1c0] sm:$0xff]   ;;  %v1393_v3 = vld [vmem:[%s1542_s13 + $0x10] ss:$36 sps:$4 sm:$0xff]   ;;  %v1397_v7 = vld [vmem:[%s1542_s13 + $0x18] ss:$36 sps:$4 sm:$0xff]  }
  0x22   : > { %1208 = vmatprep.subr.bf16.mxu0 %v1348_v24  ;;  %v1395_v4 = vld [vmem:[%s1542_s13 + $0x14] ss:$36 sps:$4 sm:$0xff]   ;;  %v1396_v5 = vld [vmem:[%s1693_s1 + $0x180] sm:$0xff]   ;;  %v1402_v11 = vld [vmem:[%s1693_s1 + $0x228] sm:$0xff]  }
  0x23   : > { %1229 = vmatpush3.bf16.msra.mxu1 %v1347_v23  ;;  %v1399_v8 = vld [vmem:[%s1542_s13 + $0x1c] ss:$36 sps:$4 sm:$0xff]   ;;  %v1401_v10 = vld [vmem:[%s1693_s1 + $0x230] sm:$0xff]   ;;  %v1406_v15 = vld [vmem:[%s1693_s1 + $0x208] sm:$0xff]  }
  0x24   : > { %1230 = vmatprep.subr.bf16.mxu1 %v1350_v26  ;;  %v1400_v9 = vld [vmem:[%s1693_s1 + $0x238] sm:$0xff]   ;;  %v1403_v12 = vld [vmem:[%s1693_s1 + $0x220] sm:$0xff]   ;;  %v1405_v14 = vld [vmem:[%s1693_s1 + $0x210] sm:$0xff]  }
  0x25   : > { %1209 = vmatpush3.bf16.msra.mxu0 %v1349_v25  ;;  %v1404_v13 = vld [vmem:[%s1693_s1 + $0x218] sm:$0xff]   ;;  %v1407_v16 = vld [vmem:[%s1693_s1 + $0x200] sm:$0xff]  }
  0x26   : > { %1210 = vmatprep.subr.bf16.mxu0 %v1352_v28  ;;  %v1408_v17 = vld [vmem:[%s1542_s13 + $0x20] ss:$36 sps:$4 sm:$0xff]   ;;  %s1102_s13 = sshll.u32 %s1697_s17, 2 }
  0x27   : > { %1231 = vmatpush3.bf16.msra.mxu1 %v1351_v27  ;;  %s175_s20 = scalar_lea.vmem %s1695_s3, %s1102_s13 }
  0x28   : > { %1232 = vmatprep.subr.bf16.mxu1 %v1354_v30  ;;  %v1103_v30 = vld [vmem:[%s1694_s2] ss:$0 sm:$0xff] }
  0x29   : > { %1211 = vmatpush3.bf16.msra.mxu0 %v1353_v29 }
  0x2a   : > { %1240 = vmatprep.subr.bf16.mxu0 %v1359_v34 }
  0x2b   : > { %1233 = vmatpush3.bf16.msra.mxu1 %v1358_v33 }
  0x2c   : > { %850 = vmatmul.mubr.bf16.vlgmr.msra.gmra.mxu0 %v1355_v31  ;;  %1262 = vmatprep.subr.bf16.mxu1 %v1364_v38 }
  0x2d   : > { %1241 = vmatpush3.bf16.msra.mxu0 %v1363_v37  ;;  %931 = vmatprep.mubr.bf16.mxu0 %v1395_v4 }
  0x2e   : > { %891 = vmatmul.mubr.bf16.vlgmr.msra.gmra.mxu1 %v1360_v35  ;;  %1242 = vmatprep.subr.bf16.mxu0 %v1366_v40 }
  0x2f   : > { %1263 = vmatpush3.bf16.msra.mxu1 %v1365_v39  ;;  %972 = vmatprep.mubr.bf16.mxu1 %v1399_v8 }
  0x30   : > { %1264 = vmatprep.subr.bf16.mxu1 %v1368_v42 }
  0x31   : > { %1243 = vmatpush3.bf16.msra.mxu0 %v1367_v41 }
  0x32   : > { %1244 = vmatprep.subr.bf16.mxu0 %v1370_v44 }
  0x33   : > { %1265 = vmatpush3.bf16.msra.mxu1 %v1369_v43 }
  0x34   : > { %1266 = vmatprep.subr.bf16.mxu1 %v1372_v46 }
  0x35   : > { %1245 = vmatpush3.bf16.msra.mxu0 %v1371_v45 }
  0x36   : > { %1246 = vmatprep.subr.bf16.mxu0 %v1374_v48 }
  0x37   : > { %1267 = vmatpush3.bf16.msra.mxu1 %v1373_v47 }
  0x38   : > { %1268 = vmatprep.subr.bf16.mxu1 %v1376_v50 }
  0x39   : > { %1247 = vmatpush3.bf16.msra.mxu0 %v1375_v49 }
  0x3a   : > { %1248 = vmatprep.subr.bf16.mxu0 %v1378_v52 }
  0x3b   : > { %1269 = vmatpush3.bf16.msra.mxu1 %v1377_v51 }
  0x3c   : > { %1270 = vmatprep.subr.bf16.mxu1 %v1380_v54 }
  0x3d   : > { %1249 = vmatpush3.bf16.msra.mxu0 %v1379_v53 }
  0x3e   : > { %1250 = vmatprep.subr.bf16.mxu0 %v1382_v56 }
  0x3f   : > { %1271 = vmatpush3.bf16.msra.mxu1 %v1381_v55 }
  0x40   : > { %1272 = vmatprep.subr.bf16.mxu1 %v1384_v58 }
  0x41   : > { %1251 = vmatpush3.bf16.msra.mxu0 %v1383_v57 }
  0x42   : > { %1252 = vmatprep.subr.bf16.mxu0 %v1386_v60 }
  0x43   : > { %1273 = vmatpush3.bf16.msra.mxu1 %v1385_v59 }
  0x44   : > { %1274 = vmatprep.subr.bf16.mxu1 %v1388_v62 }
  0x45   : > { %1253 = vmatpush3.bf16.msra.mxu0 %v1387_v61 }
  0x46   : > { %1254 = vmatprep.subr.bf16.mxu0 %v1390_v0 }
  0x47   : > { %1275 = vmatpush3.bf16.msra.mxu1 %v1389_v63 }
  0x48   : > { %1276 = vmatprep.subr.bf16.mxu1 %v1392_v2 }
  0x49   : > { %1255 = vmatpush3.bf16.msra.mxu0 %v1391_v1 }
  0x4a   : > { %1293 = vmatprep.subr.bf16.mxu0 %v1417_v6 }
  0x4b   : > { %1277 = vmatpush3.bf16.msra.mxu1 %v1396_v5 }
  0x4c   : > { %932 = vmatmul.mubr.bf16.vlgmr.msra.gmra.mxu0 %v1393_v3 }
  0x4d   : > { %1309 = vmatprep.mubr.msk.bf16.mxu0 %vm1418_vm0, %v1417_v6  ;;  %1294 = vmatpush3.bf16.msra.mxu0 %v1400_v9 }
  0x4e   : > { %973 = vmatmul.mubr.bf16.vlgmr.msra.gmra.mxu1 %v1397_v7  ;;  %1295 = vmatprep.subr.bf16.mxu0 %v1417_v6 }
  0x51   : > { %1296 = vmatpush3.bf16.msra.mxu0 %v1401_v10 }
  0x52   : > { %1297 = vmatprep.subr.bf16.mxu0 %v1417_v6 }
  0x55   : > { %1298 = vmatpush3.bf16.msra.mxu0 %v1402_v11 }
  0x56   : > { %1299 = vmatprep.subr.bf16.mxu0 %v1417_v6 }
  0x59   : > { %1300 = vmatpush3.bf16.msra.mxu0 %v1403_v12 }
  0x5a   : > { %1301 = vmatprep.subr.bf16.mxu0 %v1417_v6 }
  0x5d   : > { %1302 = vmatpush3.bf16.msra.mxu0 %v1404_v13 }
  0x5e   : > { %1303 = vmatprep.subr.bf16.mxu0 %v1417_v6 }
  0x61   : > { %1304 = vmatpush3.bf16.msra.mxu0 %v1405_v14 }
  0x62   : > { %1305 = vmatprep.subr.bf16.mxu0 %v1417_v6 }
  0x65   : > { %1306 = vmatpush3.bf16.msra.mxu0 %v1406_v15 }
  0x66   : > { %1307 = vmatprep.subr.bf16.mxu0 %v1417_v6 }
  0x69   : > { %1308 = vmatpush3.bf16.msra.mxu0 %v1407_v16 }
  0x6c   : > { %1310 = vmatmul.mubr.bf16.vlgmr.msra.gmra.mxu0 %v1408_v17 }
  0xec   : > { %v1212_v18 = vpop.f32.mrf.mxu0 }
  0xee   : > { %v1213_v19 = vpop.f32.mrf.mxu0  ;;  %v1234_v20 = vpop.f32.mrf.mxu1 }
  0xef   : > { %v1214_v29 = vadd.f32 %v1213_v19, %v1212_v18 }
  0xf0   : > { %v1215_v21 = vpop.f32.mrf.mxu0  ;;  %v1235_v22 = vpop.f32.mrf.mxu1 }
  0xf1   : > { %v852_v33 = vadd.f32 %v1214_v29, %v1103_v30  ;;  %v1236_v34 = vadd.f32 %v1235_v22, %v1234_v20 }
  0xf2   : > { %v1216_v23 = vpop.f32.mrf.mxu0  ;;  %v1237_v24 = vpop.f32.mrf.mxu1 }
  0xf3   : > { %v1217_v35 = vadd.f32 %v1216_v23, %v1215_v21  ;;  %v893_v39 = vadd.f32 %v1236_v34, %v852_v33 }
  0xf4   : > { %v1238_v26 = vpop.f32.mrf.mxu1 }
  0xf5   : > { %v855_v40 = vadd.f32 %v1217_v35, %v1103_v30  ;;  %v1239_v41 = vadd.f32 %v1238_v26, %v1237_v24 }
  0xf7   : > { %v896_v46 = vadd.f32 %v1239_v41, %v855_v40 }
 0x10c   : > { %v1256_v25 = vpop.f32.mrf.mxu0 }
 0x10e   : > { %v1257_v27 = vpop.f32.mrf.mxu0  ;;  %v1278_v28 = vpop.f32.mrf.mxu1 }
 0x10f   : > { %v1258_v36 = vadd.f32 %v1257_v27, %v1256_v25 }
 0x110   : > { %v1259_v31 = vpop.f32.mrf.mxu0  ;;  %v1279_v32 = vpop.f32.mrf.mxu1 }
 0x111   : > { %v934_v42 = vadd.f32 %v1258_v36, %v893_v39  ;;  %v1280_v43 = vadd.f32 %v1279_v32, %v1278_v28 }
 0x112   : > { %v1260_v37 = vpop.f32.mrf.mxu0  ;;  %v1281_v38 = vpop.f32.mrf.mxu1 }
 0x113   : > { %v1261_v44 = vadd.f32 %v1260_v37, %v1259_v31  ;;  %v975_v49 = vadd.f32 %v1280_v43, %v934_v42 }
 0x114   : > { %v1282_v45 = vpop.f32.mrf.mxu1 }
 0x115   : > { %v937_v47 = vadd.f32 %v1261_v44, %v896_v46  ;;  %v1283_v48 = vadd.f32 %v1282_v45, %v1281_v38 }
 0x117   : > { %v978_v53 = vadd.f32 %v1283_v48, %v937_v47 }
 0x12c   : > { %v1015_v50 = vpop.f32.mrf.mxu0 }
 0x12d   : > { %v1016_v51 = vadd.f32 %v1015_v50, %v975_v49 }
 0x12e   : > { %v1311_v52 = vpop.f32.mrf.mxu0 }
 0x12f   : > { %v1024_v55 = vmul.f32 0.01, %v1016_v51  ;;  %vm1022_vm1 = vcmp.ge.f32.partialorder %v1016_v51, 0.0 }
 0x130   : > { %v1018_v54 = vpop.f32.mrf.mxu0 }
 0x131   : > { %v1019_v56 = vadd.f32 %v1018_v54, %v978_v53  ;;  %v1026_v59 = vsel %vm1022_vm1, %v1016_v51, %v1024_v55 }
 0x132   : > { %v1312_v57 = vpop.f32.mrf.mxu0 }
 0x133   : > { %vm1023_vm2 = vcmp.ge.f32.partialorder %v1019_v56, 0.0  ;;  %v1025_v58 = vmul.f32 0.01, %v1019_v56 }
 0x135   : > { %v1027_v60 = vsel %vm1023_vm2, %v1019_v56, %v1025_v58 }
 0x136   : > { %v1194_v61 = vpack.c.bf16 %v1027_v60, %v1026_v59 }
 0x138   : > { %1195 = vst [vmem:[%s175_s20] sm:$0xff] %v1194_v61  }
 0x139 PF: > { %s13_s12 = sadd.s32 1, %s1415_s12  }
 0x13a   : > { %p10_p4 = scmp.ge.s32.totalorder %s13_s12, 4  }
 0x13c   :  { %12 = sbr.rel (!%p10_p4) target bundleno = 1 (0x1), region = 62 }

// kernel: encoder_forward.12
= control target key start
LH: loop header
LB: loop body
LE: loop exit
PB: predicated region body
PF: predicated region fallthrough
CT: control target
= control target key end

     0   :  { %s1511_s15 = smov 0   ;;  %s1767_s0 = inlined_call_operand.vmem [shape: bf16[32,1152], index: 0, kind: input, shape index: {}]   ;;  %s1768_s1 = inlined_call_operand.vmem [shape: bf16[1152,128], index: 1, kind: input, shape index: {}]   ;;  %s1769_s2 = inlined_call_operand.vmem [shape: f32[1,128], index: 2, kind: input, shape index: {}]   ;;  %s1770_s3 = inlined_call_operand.vmem [shape: bf16[32,128], index: 3, kind: input, shape index: {}]   ;;  %s1771_s4 = inlined_call_operand.vmem [shape: bf16[32,128], index: 4, kind: output, shape index: {}]  }
   0x1 LB: > { %s1155_s16 = sadd.s32 4294967295, %s1482_s15   ;;  %p1159_p0 = scmp.ge.s32.totalorder %s1482_s15, 1  ;;  %s1482_s15 = sphi %s1511_s15, %s14_s15  }
   0x2   : > { %p175_p1 = scmp.lt.s32.totalorder %s1482_s15, 3 }
   0x4   : > { %p176_p2 = pnand %p1159_p0, %p175_p1 }
   0x5   : > { %s1160_s21 = sshll.u32 (!%p176_p2), %s1155_s16, 1 }
   0x6   : > { %179 = sbr.rel (%p176_p2) target bundleno = 312 (0x138), region = 36  ;;  %p208_p3 = scmp.lt.s32.totalorder (!%p176_p2), %s1160_s21, 3 }
   0xb   : > { %v1391_v0 = vld [vmem:[%s1768_s1 + $0x78] sm:$0xff]   ;;  %v1395_v4 = vld [vmem:[%s1768_s1 + $0x70] sm:$0xff]   ;;  %v1399_v8 = vld [vmem:[%s1768_s1 + $0x68] sm:$0xff]   ;;  %s1773_s21 = smov (!%p208_p3, %s1160_s21), 3  ;;  %vm1485_vm0 = vmmov 0  }
   0xc   : > { %v1392_v1 = vld [vmem:[%s1768_s1 + $0x38] sm:$0xff]   ;;  %1263 = vmatprep.subr.bf16.mxu0 %v1391_v0  ;;  %v1396_v5 = vld [vmem:[%s1768_s1 + $0x30] sm:$0xff]   ;;  %v1400_v9 = vld [vmem:[%s1768_s1 + $0x28] sm:$0xff]   ;;  %s1380_s19 = smul.u32 36, %s1773_s21 }
   0xd   : > { %v1393_v2 = vld [vmem:[%s1768_s1 + $0xf8] sm:$0xff]   ;;  %1264 = vmatpush3.bf16.msra.mxu0 %v1392_v1  ;;  %v1397_v6 = vld [vmem:[%s1768_s1 + $0xf0] sm:$0xff]   ;;  %v1401_v10 = vld [vmem:[%s1768_s1 + $0xe8] sm:$0xff]  }
   0xe   : > { %v1394_v3 = vld [vmem:[%s1768_s1 + $0xb8] sm:$0xff]   ;;  %1285 = vmatprep.subr.bf16.mxu1 %v1393_v2  ;;  %1265 = vmatprep.subr.bf16.mxu0 %v1395_v4  ;;  %v1398_v7 = vld [vmem:[%s1768_s1 + $0xb0] sm:$0xff]   ;;  %v1402_v11 = vld [vmem:[%s1768_s1 + $0xa8] sm:$0xff]   ;;  %s1614_s30 = scalar_lea.vmem %s1767_s0, %s1380_s19 }
   0xf   : > { %1286 = vmatpush3.bf16.msra.mxu1 %v1394_v3  ;;  %v1403_v12 = vld [vmem:[%s1768_s1 + $0x60] sm:$0xff]   ;;  %v1407_v16 = vld [vmem:[%s1768_s1 + $0x58] sm:$0xff]   ;;  %v1411_v20 = vld [vmem:[%s1768_s1 + $0x50] sm:$0xff]  }
  0x10   : > { %1287 = vmatprep.subr.bf16.mxu1 %v1397_v6  ;;  %v1404_v13 = vld [vmem:[%s1768_s1 + $0x20] sm:$0xff]   ;;  %v1408_v17 = vld [vmem:[%s1768_s1 + $0x18] sm:$0xff]   ;;  %v1412_v21 = vld [vmem:[%s1768_s1 + $0x10] sm:$0xff]   ;;  %v1484_v6 = vmov 0.0  }
  0x11   : > { %1266 = vmatpush3.bf16.msra.mxu0 %v1396_v5  ;;  %v1405_v14 = vld [vmem:[%s1768_s1 + $0xe0] sm:$0xff]   ;;  %v1409_v18 = vld [vmem:[%s1768_s1 + $0xd8] sm:$0xff]   ;;  %v1413_v22 = vld [vmem:[%s1768_s1 + $0xd0] sm:$0xff]  }
  0x12   : > { %1267 = vmatprep.subr.bf16.mxu0 %v1399_v8  ;;  %v1406_v15 = vld [vmem:[%s1768_s1 + $0xa0] sm:$0xff]   ;;  %v1410_v19 = vld [vmem:[%s1768_s1 + $0x98] sm:$0xff]   ;;  %v1414_v23 = vld [vmem:[%s1768_s1 + $0x90] sm:$0xff]  }
  0x13   : > { %1288 = vmatpush3.bf16.msra.mxu1 %v1398_v7  ;;  %v1415_v24 = vld [vmem:[%s1768_s1 + $0x48] sm:$0xff]   ;;  %v1419_v28 = vld [vmem:[%s1768_s1 + $0x40] sm:$0xff]   ;;  %v1426_v34 = vld [vmem:[%s1768_s1 + $0x178] sm:$0xff]  }
  0x14   : > { %1289 = vmatprep.subr.bf16.mxu1 %v1401_v10  ;;  %v1416_v25 = vld [vmem:[%s1768_s1 + $0x8] sm:$0xff]   ;;  %v1420_v29 = vld [vmem:[%s1768_s1] sm:$0xff]   ;;  %v1430_v37 = vld [vmem:[%s1768_s1 + $0x138] sm:$0xff]  }
  0x15   : > { %1268 = vmatpush3.bf16.msra.mxu0 %v1400_v9  ;;  %v1417_v26 = vld [vmem:[%s1768_s1 + $0xc8] sm:$0xff]   ;;  %v1421_v30 = vld [vmem:[%s1768_s1 + $0xc0] sm:$0xff]   ;;  %v1431_v38 = vld [vmem:[%s1768_s1 + $0x1f8] sm:$0xff]  }
  0x16   : > { %1269 = vmatprep.subr.bf16.mxu0 %v1403_v12  ;;  %v1418_v27 = vld [vmem:[%s1768_s1 + $0x88] sm:$0xff]   ;;  %v1422_v31 = vld [vmem:[%s1614_s30] ss:$36 sps:$4 sm:$0xff]   ;;  %v1432_v39 = vld [vmem:[%s1768_s1 + $0x1b8] sm:$0xff]  }
  0x17   : > { %1290 = vmatpush3.bf16.msra.mxu1 %v1402_v11  ;;  %v1424_v32 = vld [vmem:[%s1614_s30 + $0x4] ss:$36 sps:$4 sm:$0xff]   ;;  %v1429_v36 = vld [vmem:[%s1614_s30 + $0xc] ss:$36 sps:$4 sm:$0xff]   ;;  %v1445_v52 = vld [vmem:[%s1768_s1 + $0x158] sm:$0xff]  }
  0x18   : > { %1291 = vmatprep.subr.bf16.mxu1 %v1405_v14  ;;  %v1425_v33 = vld [vmem:[%s1768_s1 + $0x80] sm:$0xff]   ;;  %898 = vmatprep.mubr.bf16.mxu0 %v1424_v32  ;;  %v1427_v35 = vld [vmem:[%s1614_s30 + $0x8] ss:$36 sps:$4 sm:$0xff]   ;;  %v1433_v40 = vld [vmem:[%s1768_s1 + $0x170] sm:$0xff]  }
  0x19   : > { %1270 = vmatpush3.bf16.msra.mxu0 %v1404_v13  ;;  %939 = vmatprep.mubr.bf16.mxu1 %v1429_v36  ;;  %v1434_v41 = vld [vmem:[%s1768_s1 + $0x130] sm:$0xff]   ;;  %v1437_v44 = vld [vmem:[%s1768_s1 + $0x168] sm:$0xff]   ;;  %v1441_v48 = vld [vmem:[%s1768_s1 + $0x160] sm:$0xff]  }
  0x1a   : > { %1271 = vmatprep.subr.bf16.mxu0 %v1407_v16  ;;  %v1435_v42 = vld [vmem:[%s1768_s1 + $0x1f0] sm:$0xff]   ;;  %v1438_v45 = vld [vmem:[%s1768_s1 + $0x128] sm:$0xff]   ;;  %v1442_v49 = vld [vmem:[%s1768_s1 + $0x120] sm:$0xff]  }
  0x1b   : > { %1292 = vmatpush3.bf16.msra.mxu1 %v1406_v15  ;;  %v1436_v43 = vld [vmem:[%s1768_s1 + $0x1b0] sm:$0xff]   ;;  %v1439_v46 = vld [vmem:[%s1768_s1 + $0x1e8] sm:$0xff]   ;;  %v1443_v50 = vld [vmem:[%s1768_s1 + $0x1e0] sm:$0xff]  }
  0x1c   : > { %1293 = vmatprep.subr.bf16.mxu1 %v1409_v18  ;;  %v1440_v47 = vld [vmem:[%s1768_s1 + $0x1a8] sm:$0xff]   ;;  %v1444_v51 = vld [vmem:[%s1768_s1 + $0x1a0] sm:$0xff]   ;;  %v1446_v53 = vld [vmem:[%s1768_s1 + $0x118] sm:$0xff]  }
  0x1d   : > { %1272 = vmatpush3.bf16.msra.mxu0 %v1408_v17  ;;  %v1447_v54 = vld [vmem:[%s1768_s1 + $0x1d8] sm:$0xff]   ;;  %v1449_v56 = vld [vmem:[%s1768_s1 + $0x150] sm:$0xff]   ;;  %v1453_v60 = vld [vmem:[%s1768_s1 + $0x148] sm:$0xff]  }
  0x1e   : > { %1273 = vmatprep.subr.bf16.mxu0 %v1411_v20  ;;  %v1448_v55 = vld [vmem:[%s1768_s1 + $0x198] sm:$0xff]   ;;  %v1450_v57 = vld [vmem:[%s1768_s1 + $0x110] sm:$0xff]   ;;  %v1454_v61 = vld [vmem:[%s1768_s1 + $0x108] sm:$0xff]  }
  0x1f   : > { %1294 = vmatpush3.bf16.msra.mxu1 %v1410_v19  ;;  %v1451_v58 = vld [vmem:[%s1768_s1 + $0x1d0] sm:$0xff]   ;;  %v1455_v62 = vld [vmem:[%s1768_s1 + $0x1c8] sm:$0xff]   ;;  %v1457_v0 = vld [vmem:[%s1768_s1 + $0x140] sm:$0xff]  }
  0x20   : > { %1295 = vmatprep.subr.bf16.mxu1 %v1413_v22  ;;  %v1452_v59 = vld [vmem:[%s1768_s1 + $0x190] sm:$0xff]   ;;  %v1456_v63 = vld [vmem:[%s1768_s1 + $0x188] sm:$0xff]   ;;  %v1458_v1 = vld [vmem:[%s1768_s1 + $0x100] sm:$0xff]  }
  0x21   : > { %1274 = vmatpush3.bf16.msra.mxu0 %v1412_v21  ;;  %v1459_v2 = vld [vmem:[%s1768_s1 + $0x1c0] sm:$0xff]   ;;  %v1460_v3 = vld [vmem:[%s1614_s30 + $0x10] ss:$36 sps:$4 sm:$0xff]   ;;  %v1464_v7 = vld [vmem:[%s1614_s30 + $0x18] ss:$36 sps:$4 sm:$0xff]  }
  0x22   : > { %1275 = vmatprep.subr.bf16.mxu0 %v1415_v24  ;;  %v1462_v4 = vld [vmem:[%s1614_s30 + $0x14] ss:$36 sps:$4 sm:$0xff]   ;;  %v1463_v5 = vld [vmem:[%s1768_s1 + $0x180] sm:$0xff]   ;;  %v1469_v11 = vld [vmem:[%s1768_s1 + $0x228] sm:$0xff]  }
  0x23   : > { %1296 = vmatpush3.bf16.msra.mxu1 %v1414_v23  ;;  %v1466_v8 = vld [vmem:[%s1614_s30 + $0x1c] ss:$36 sps:$4 sm:$0xff]   ;;  %v1468_v10 = vld [vmem:[%s1768_s1 + $0x230] sm:$0xff]   ;;  %v1473_v15 = vld [vmem:[%s1768_s1 + $0x208] sm:$0xff]  }
  0x24   : > { %1297 = vmatprep.subr.bf16.mxu1 %v1417_v26  ;;  %v1467_v9 = vld [vmem:[%s1768_s1 + $0x238] sm:$0xff]   ;;  %v1470_v12 = vld [vmem:[%s1768_s1 + $0x220] sm:$0xff]   ;;  %v1472_v14 = vld [vmem:[%s1768_s1 + $0x210] sm:$0xff]  }
  0x25   : > { %1276 = vmatpush3.bf16.msra.mxu0 %v1416_v25  ;;  %v1471_v13 = vld [vmem:[%s1768_s1 + $0x218] sm:$0xff]   ;;  %v1474_v16 = vld [vmem:[%s1768_s1 + $0x200] sm:$0xff]  }
  0x26   : > { %1277 = vmatprep.subr.bf16.mxu0 %v1419_v28  ;;  %v1475_v17 = vld [vmem:[%s1614_s30 + $0x20] ss:$36 sps:$4 sm:$0xff]   ;;  %s1163_s30 = sshll.u32 %s1773_s21, 2 }
  0x27   : > { %1298 = vmatpush3.bf16.msra.mxu1 %v1418_v27  ;;  %s218_s29 = scalar_lea.vmem %s1770_s3, %s1163_s30  ;;  %s224_s5 = scalar_lea.vmem %s1771_s4, %s1163_s30 }
  0x28   : > { %1299 = vmatprep.subr.bf16.mxu1 %v1421_v30  ;;  %v1166_v30 = vld [vmem:[%s1769_s2] ss:$0 sm:$0xff] }
  0x29   : > { %1278 = vmatpush3.bf16.msra.mxu0 %v1420_v29 }
  0x2a   : > { %1307 = vmatprep.subr.bf16.mxu0 %v1426_v34 }
  0x2b   : > { %1300 = vmatpush3.bf16.msra.mxu1 %v1425_v33 }
  0x2c   : > { %899 = vmatmul.mubr.bf16.vlgmr.msra.gmra.mxu0 %v1422_v31  ;;  %1329 = vmatprep.subr.bf16.mxu1 %v1431_v38 }
  0x2d   : > { %1308 = vmatpush3.bf16.msra.mxu0 %v1430_v37  ;;  %980 = vmatprep.mubr.bf16.mxu0 %v1462_v4 }
  0x2e   : > { %940 = vmatmul.mubr.bf16.vlgmr.msra.gmra.mxu1 %v1427_v35  ;;  %1309 = vmatprep.subr.bf16.mxu0 %v1433_v40 }
  0x2f   : > { %1330 = vmatpush3.bf16.msra.mxu1 %v1432_v39  ;;  %1021 = vmatprep.mubr.bf16.mxu1 %v1466_v8 }
  0x30   : > { %1331 = vmatprep.subr.bf16.mxu1 %v1435_v42 }
  0x31   : > { %1310 = vmatpush3.bf16.msra.mxu0 %v1434_v41 }
  0x32   : > { %1311 = vmatprep.subr.bf16.mxu0 %v1437_v44 }
  0x33   : > { %1332 = vmatpush3.bf16.msra.mxu1 %v1436_v43 }
  0x34   : > { %1333 = vmatprep.subr.bf16.mxu1 %v1439_v46 }
  0x35   : > { %1312 = vmatpush3.bf16.msra.mxu0 %v1438_v45 }
  0x36   : > { %1313 = vmatprep.subr.bf16.mxu0 %v1441_v48 }
  0x37   : > { %1334 = vmatpush3.bf16.msra.mxu1 %v1440_v47 }
  0x38   : > { %1335 = vmatprep.subr.bf16.mxu1 %v1443_v50  ;;  %v1255_v50 = vld [vmem:[%s218_s29] sm:$0xff]  }
  0x39   : > { %1314 = vmatpush3.bf16.msra.mxu0 %v1442_v49 }
  0x3a   : > { %1315 = vmatprep.subr.bf16.mxu0 %v1445_v52 }
  0x3b   : > { %1336 = vmatpush3.bf16.msra.mxu1 %v1444_v51 }
  0x3c   : > { %1337 = vmatprep.subr.bf16.mxu1 %v1447_v54  ;;  %v1256_v54 = vunpack.c.l.bf16 %v1255_v50 }
  0x3d   : > { %1316 = vmatpush3.bf16.msra.mxu0 %v1446_v53 }
  0x3e   : > { %1317 = vmatprep.subr.bf16.mxu0 %v1449_v56  ;;  %v1257_v56 = vunpack.c.h.bf16 %v1255_v50 }
  0x3f   : > { %1338 = vmatpush3.bf16.msra.mxu1 %v1448_v55 }
  0x40   : > { %1339 = vmatprep.subr.bf16.mxu1 %v1451_v58 }
  0x41   : > { %1318 = vmatpush3.bf16.msra.mxu0 %v1450_v57 }
  0x42   : > { %1319 = vmatprep.subr.bf16.mxu0 %v1453_v60 }
  0x43   : > { %1340 = vmatpush3.bf16.msra.mxu1 %v1452_v59 }
  0x44   : > { %1341 = vmatprep.subr.bf16.mxu1 %v1455_v62 }
  0x45   : > { %1320 = vmatpush3.bf16.msra.mxu0 %v1454_v61 }
  0x46   : > { %1321 = vmatprep.subr.bf16.mxu0 %v1457_v0 }
  0x47   : > { %1342 = vmatpush3.bf16.msra.mxu1 %v1456_v63 }
  0x48   : > { %1343 = vmatprep.subr.bf16.mxu1 %v1459_v2 }
  0x49   : > { %1322 = vmatpush3.bf16.msra.mxu0 %v1458_v1 }
  0x4a   : > { %1360 = vmatprep.subr.bf16.mxu0 %v1484_v6 }
  0x4b   : > { %1344 = vmatpush3.bf16.msra.mxu1 %v1463_v5 }
  0x4c   : > { %981 = vmatmul.mubr.bf16.vlgmr.msra.gmra.mxu0 %v1460_v3 }
  0x4d   : > { %1376 = vmatprep.mubr.msk.bf16.mxu0 %vm1485_vm0, %v1484_v6  ;;  %1361 = vmatpush3.bf16.msra.mxu0 %v1467_v9 }
  0x4e   : > { %1022 = vmatmul.mubr.bf16.vlgmr.msra.gmra.mxu1 %v1464_v7  ;;  %1362 = vmatprep.subr.bf16.mxu0 %v1484_v6 }
  0x51   : > { %1363 = vmatpush3.bf16.msra.mxu0 %v1468_v10 }
  0x52   : > { %1364 = vmatprep.subr.bf16.mxu0 %v1484_v6 }
  0x55   : > { %1365 = vmatpush3.bf16.msra.mxu0 %v1469_v11 }
  0x56   : > { %1366 = vmatprep.subr.bf16.mxu0 %v1484_v6 }
  0x59   : > { %1367 = vmatpush3.bf16.msra.mxu0 %v1470_v12 }
  0x5a   : > { %1368 = vmatprep.subr.bf16.mxu0 %v1484_v6 }
  0x5d   : > { %1369 = vmatpush3.bf16.msra.mxu0 %v1471_v13 }
  0x5e   : > { %1370 = vmatprep.subr.bf16.mxu0 %v1484_v6 }
  0x61   : > { %1371 = vmatpush3.bf16.msra.mxu0 %v1472_v14 }
  0x62   : > { %1372 = vmatprep.subr.bf16.mxu0 %v1484_v6 }
  0x65   : > { %1373 = vmatpush3.bf16.msra.mxu0 %v1473_v15 }
  0x66   : > { %1374 = vmatprep.subr.bf16.mxu0 %v1484_v6 }
  0x69   : > { %1375 = vmatpush3.bf16.msra.mxu0 %v1474_v16 }
  0x6c   : > { %1377 = vmatmul.mubr.bf16.vlgmr.msra.gmra.mxu0 %v1475_v17 }
  0xec   : > { %v1279_v18 = vpop.f32.mrf.mxu0 }
  0xee   : > { %v1280_v19 = vpop.f32.mrf.mxu0  ;;  %v1301_v20 = vpop.f32.mrf.mxu1 }
  0xef   : > { %v1281_v29 = vadd.f32 %v1280_v19, %v1279_v18 }
  0xf0   : > { %v1282_v21 = vpop.f32.mrf.mxu0  ;;  %v1302_v22 = vpop.f32.mrf.mxu1 }
  0xf1   : > { %v901_v34 = vadd.f32 %v1281_v29, %v1166_v30  ;;  %v1303_v35 = vadd.f32 %v1302_v22, %v1301_v20 }
  0xf2   : > { %v1283_v23 = vpop.f32.mrf.mxu0  ;;  %v1304_v24 = vpop.f32.mrf.mxu1 }
  0xf3   : > { %v1284_v33 = vadd.f32 %v1283_v23, %v1282_v21  ;;  %v942_v41 = vadd.f32 %v1303_v35, %v901_v34 }
  0xf4   : > { %v1305_v26 = vpop.f32.mrf.mxu1 }
  0xf5   : > { %v904_v38 = vadd.f32 %v1284_v33, %v1166_v30  ;;  %v1306_v39 = vadd.f32 %v1305_v26, %v1304_v24 }
  0xf7   : > { %v945_v44 = vadd.f32 %v1306_v39, %v904_v38 }
 0x10c   : > { %v1323_v25 = vpop.f32.mrf.mxu0 }
 0x10e   : > { %v1324_v27 = vpop.f32.mrf.mxu0  ;;  %v1345_v28 = vpop.f32.mrf.mxu1 }
 0x10f   : > { %v1325_v40 = vadd.f32 %v1324_v27, %v1323_v25 }
 0x110   : > { %v1326_v31 = vpop.f32.mrf.mxu0  ;;  %v1346_v32 = vpop.f32.mrf.mxu1 }
 0x111   : > { %v983_v45 = vadd.f32 %v1325_v40, %v942_v41  ;;  %v1347_v46 = vadd.f32 %v1346_v32, %v1345_v28 }
 0x112   : > { %v1327_v36 = vpop.f32.mrf.mxu0  ;;  %v1348_v37 = vpop.f32.mrf.mxu1 }
 0x113   : > { %v1328_v42 = vadd.f32 %v1327_v36, %v1326_v31  ;;  %v1024_v51 = vadd.f32 %v1347_v46, %v983_v45 }
 0x114   : > { %v1349_v43 = vpop.f32.mrf.mxu1 }
 0x115   : > { %v986_v47 = vadd.f32 %v1328_v42, %v945_v44  ;;  %v1350_v48 = vadd.f32 %v1349_v43, %v1348_v37 }
 0x117   : > { %v1027_v55 = vadd.f32 %v1350_v48, %v986_v47 }
 0x12c   : > { %v1064_v49 = vpop.f32.mrf.mxu0 }
 0x12d   : > { %v1065_v53 = vadd.f32 %v1064_v49, %v1024_v51 }
 0x12e   : > { %v1378_v52 = vpop.f32.mrf.mxu0 }
 0x12f   : > { %v1075_v60 = vadd.f32 %v1256_v54, %v1065_v53 }
 0x130   : > { %v1067_v57 = vpop.f32.mrf.mxu0 }
 0x131   : > { %v1068_v58 = vadd.f32 %v1067_v57, %v1027_v55 }
 0x132   : > { %v1379_v59 = vpop.f32.mrf.mxu0 }
 0x133   : > { %v1076_v61 = vadd.f32 %v1257_v56, %v1068_v58 }
 0x135   : > { %v1261_v62 = vpack.c.bf16 %v1076_v61, %v1075_v60 }
 0x137   : > { %1262 = vst [vmem:[%s224_s5] sm:$0xff] %v1261_v62  }
 0x138 PF: > { %s14_s15 = sadd.s32 1, %s1482_s15  }
 0x139   : > { %p11_p4 = scmp.ge.s32.totalorder %s14_s15, 4  }
 0x13b   :  { %13 = sbr.rel (!%p11_p4) target bundleno = 1 (0x1), region = 69 }

// kernel: encoder_forward.17
= control target key start
LH: loop header
LB: loop body
LE: loop exit
PB: predicated region body
PF: predicated region fallthrough
CT: control target
= control target key end

     0   :  { %8 = vsyncpa [#allocation3], 0  ;;  %s4183_s0 = inlined_call_operand.vmem [shape: bf16[32,3200], index: 0, kind: input, shape index: {}]   ;;  %s4184_s1 = inlined_call_operand.vmem [shape: bf16[3200,128], index: 1, kind: input, shape index: {}]   ;;  %s4185_s2 = inlined_call_operand.vmem [shape: f32[1,128], index: 2, kind: input, shape index: {}]   ;;  %s4186_s3 = inlined_call_operand.hbm [shape: f32[32,128], index: 3, kind: output, shape index: {}]  }
   0x1   :  { %10 = vsyncpa [#allocation3 + $0x1], 0  ;;  %s3452_s12 = smov 0   ;;  %s3454_s13 = smov 0  }
   0x2   :  { %s3456_s14 = smov 0   ;;  %s3458_s15 = smov 0  }
   0x3 LB: > { %s3473_s16 = sadd.s32 4294967295, %s3425_s15   ;;  %s2548_s17 = sadd.s32 4294967294, %s3425_s15   ;;  %s3425_s15 = sphi %s3458_s15, %s4192_s15   ;;  %s3421_s14 = sphi %s3456_s14, %s4191_s14   ;;  %s3417_s13 = sphi %s3454_s13, %s4190_s13   ;;  %s3413_s12 = sphi %s3452_s12, %s4189_s12  }
   0x4   : > { %s3477_s18 = sadd.s32 1, %s3425_s15   ;;  %s91_s19 = sadd.s32 1, %s3421_s14 }
   0x5   : > { %s88_s20 = ssub.s32 %s3425_s15, %s3477_s18  ;;  %p101_p0 = scmp.ne.s32.totalorder %s3421_s14, %s3417_s13 }
   0x6   : > { %p89_p1 = scmp.eq.s32.totalorder %s88_s20, 0  ;;  %p102_p2 = scmp.eq.s32.totalorder %s3473_s16, 1 }
   0x7   : > { %p107_p3 = scmp.ne.s32.totalorder %s3417_s13, %s3413_s12  ;;  %p108_p4 = scmp.eq.s32.totalorder %s2548_s17, 1 }
   0x8   : > { %s3488_s21 = scalar_select %p89_p1, %s3421_s14, %s91_s19  }
   0x9   : > { %p3490_p5 = por %p102_p2, %p101_p0  ;;  %p3494_p6 = por %p108_p4, %p107_p3 }
   0xa   : > { %p2551_p7 = scmp.ge.s32.totalorder %s3425_s15, 1  ;;  %p142_p8 = scmp.lt.s32.totalorder %s3425_s15, 3 }
   0xc   : > { %p143_p9 = pnand %p2551_p7, %p142_p8 }
   0xd   : > { %s2553_s7 = sshll.u32 (!%p143_p9), %s3473_s16, 1  ;;  %s164_s10 = sand.u32 (!%p143_p9), 1, %s3417_s13  }
   0xe   : > { %146 = sbr.rel (%p143_p9) target bundleno = 471 (0x1d7), region = 32  ;;  %p168_p10 = scmp.lt.s32.totalorder (!%p143_p9), %s2553_s7, 3 }
   0xf   : > { %s2552_s11 = sshll.u32 (!%p143_p9), %s164_s10, 4  ;;  %s2786_s17 = sshll.u32 (!%p143_p9), %s3473_s16, 8 }
  0x10   : > { %s4139_s26 = scalar_lea.hbm (!%p143_p9), %s4186_s3, %s2786_s17  ;;  %s4143_s27 = scalar_lea.sflag (!%p143_p9), [#allocation3], %s164_s10 }
  0x11   : > { %s3429_s16 = smov (!%p143_p9), [#allocation2]  }
  0x12   : > { %s3369_s29 = sshll.u32 (!%p143_p9), %s3429_s16, 4  ;;  %s3370_s29 = int_to_ptr.vmem [resolvable:$false] %s3369_s29 }
  0x13   : > { %v3124_v0 = vld [vmem:[%s4184_s1 + $0x78] sm:$0xff]   ;;  %v3128_v4 = vld [vmem:[%s4184_s1 + $0x70] sm:$0xff]   ;;  %v3132_v8 = vld [vmem:[%s4184_s1 + $0x68] sm:$0xff]   ;;  %s4194_s7 = smov (!%p168_p10, %s2553_s7), 3  ;;  %vm3428_vm0 = vmmov 0   ;;  %s3371_s30 = scalar_lea.vmem %s3370_s29, 512 }
  0x14   : > { %v3125_v1 = vld [vmem:[%s4184_s1 + $0x38] sm:$0xff]   ;;  %2787 = vmatprep.subr.bf16.mxu0 %v3124_v0  ;;  %v3129_v5 = vld [vmem:[%s4184_s1 + $0x30] sm:$0xff]   ;;  %v3133_v9 = vld [vmem:[%s4184_s1 + $0x28] sm:$0xff]   ;;  %s3080_s19 = smul.u32 100, %s4194_s7 }
  0x15   : > { %v3126_v2 = vld [vmem:[%s4184_s1 + $0xf8] sm:$0xff]   ;;  %2788 = vmatpush3.bf16.msra.mxu0 %v3125_v1  ;;  %v3130_v6 = vld [vmem:[%s4184_s1 + $0xf0] sm:$0xff]   ;;  %v3134_v10 = vld [vmem:[%s4184_s1 + $0xe8] sm:$0xff]  }
  0x16   : > { %v3127_v3 = vld [vmem:[%s4184_s1 + $0xb8] sm:$0xff]   ;;  %2809 = vmatprep.subr.bf16.mxu1 %v3126_v2  ;;  %2789 = vmatprep.subr.bf16.mxu0 %v3128_v4  ;;  %v3131_v7 = vld [vmem:[%s4184_s1 + $0xb0] sm:$0xff]   ;;  %v3135_v11 = vld [vmem:[%s4184_s1 + $0xa8] sm:$0xff]   ;;  %s3591_s5 = scalar_lea.vmem %s4183_s0, %s3080_s19  ;;  %s166_s19 = scalar_lea.vmem [#allocation2], %s2552_s11 }
  0x17   : > { %2810 = vmatpush3.bf16.msra.mxu1 %v3127_v3  ;;  %v3136_v12 = vld [vmem:[%s4184_s1 + $0x60] sm:$0xff]   ;;  %v3140_v16 = vld [vmem:[%s4184_s1 + $0x58] sm:$0xff]   ;;  %v3144_v20 = vld [vmem:[%s4184_s1 + $0x50] sm:$0xff]   ;;  %s2486_s20 = sshll.u32 %s166_s19, 4  ;;  %s4141_s20 = int_to_ptr.vmem [resolvable:$true] %s2486_s20 }
  0x18   : > { %2811 = vmatprep.subr.bf16.mxu1 %v3130_v6  ;;  %v3137_v13 = vld [vmem:[%s4184_s1 + $0x20] sm:$0xff]   ;;  %v3141_v17 = vld [vmem:[%s4184_s1 + $0x18] sm:$0xff]   ;;  %v3145_v21 = vld [vmem:[%s4184_s1 + $0x10] sm:$0xff]   ;;  %s3365_s28 = scalar_lea.vmem %s4141_s20, 256  ;;  %p3372_p0 = scmp.lt.s32.totalorder %s4141_s20, %s3370_s29 }
  0x19   : > { %2790 = vmatpush3.bf16.msra.mxu0 %v3129_v5  ;;  %v3138_v14 = vld [vmem:[%s4184_s1 + $0xe0] sm:$0xff]   ;;  %v3142_v18 = vld [vmem:[%s4184_s1 + $0xd8] sm:$0xff]   ;;  %v3146_v22 = vld [vmem:[%s4184_s1 + $0xd0] sm:$0xff]   ;;  %p3366_p11 = scmp.ne.s32.totalorder %s4141_s20, %s3365_s28  ;;  %p3373_p1 = scmp.lt.s32.totalorder %s3371_s30, %s3365_s28 }
  0x1a   : > { %2791 = vmatprep.subr.bf16.mxu0 %v3132_v8  ;;  %v3139_v15 = vld [vmem:[%s4184_s1 + $0xa0] sm:$0xff]   ;;  %v3143_v19 = vld [vmem:[%s4184_s1 + $0x98] sm:$0xff]   ;;  %v3147_v23 = vld [vmem:[%s4184_s1 + $0x90] sm:$0xff]  }
  0x1b   : > { %2812 = vmatpush3.bf16.msra.mxu1 %v3131_v7  ;;  %v3148_v24 = vld [vmem:[%s4184_s1 + $0x48] sm:$0xff]   ;;  %v3152_v28 = vld [vmem:[%s4184_s1 + $0x40] sm:$0xff]   ;;  %v3159_v34 = vld [vmem:[%s4184_s1 + $0x178] sm:$0xff]   ;;  %p3367_p12 = pnand %p3366_p11, %p3490_p5  ;;  %p3374_p2 = por %p3373_p1, %p3372_p0 }
  0x1c   : > { %2813 = vmatprep.subr.bf16.mxu1 %v3134_v10  ;;  %v3149_v25 = vld [vmem:[%s4184_s1 + $0x8] sm:$0xff]   ;;  %v3153_v29 = vld [vmem:[%s4184_s1] sm:$0xff]   ;;  %v3163_v37 = vld [vmem:[%s4184_s1 + $0x138] sm:$0xff]  }
  0x1d   : > { %2792 = vmatpush3.bf16.msra.mxu0 %v3133_v9  ;;  %v3150_v26 = vld [vmem:[%s4184_s1 + $0xc8] sm:$0xff]   ;;  %v3154_v30 = vld [vmem:[%s4184_s1 + $0xc0] sm:$0xff]   ;;  %v3164_v38 = vld [vmem:[%s4184_s1 + $0x1f8] sm:$0xff]   ;;  %p3368_p13 = pneg %p3367_p12 }
  0x1e   : > { %2793 = vmatprep.subr.bf16.mxu0 %v3136_v12  ;;  %v3151_v27 = vld [vmem:[%s4184_s1 + $0x88] sm:$0xff]   ;;  %v3155_v31 = vld [vmem:[%s3591_s5] ss:$100 sps:$4 sm:$0xff]   ;;  %v3165_v39 = vld [vmem:[%s4184_s1 + $0x1b8] sm:$0xff]  }
  0x1f   : > { %2814 = vmatpush3.bf16.msra.mxu1 %v3135_v11  ;;  %v3157_v32 = vld [vmem:[%s3591_s5 + $0x4] ss:$100 sps:$4 sm:$0xff]   ;;  %v3162_v36 = vld [vmem:[%s3591_s5 + $0xc] ss:$100 sps:$4 sm:$0xff]   ;;  %v3178_v52 = vld [vmem:[%s4184_s1 + $0x158] sm:$0xff]   ;;  %p3375_p3 = pnand %p3374_p2, %p3368_p13 }
  0x20   : > { %2815 = vmatprep.subr.bf16.mxu1 %v3138_v14  ;;  %v3158_v33 = vld [vmem:[%s4184_s1 + $0x80] sm:$0xff]   ;;  %1967 = vmatprep.mubr.bf16.mxu0 %v3157_v32  ;;  %v3160_v35 = vld [vmem:[%s3591_s5 + $0x8] ss:$100 sps:$4 sm:$0xff]   ;;  %v3166_v40 = vld [vmem:[%s4184_s1 + $0x170] sm:$0xff]  }
  0x21   : > { %2794 = vmatpush3.bf16.msra.mxu0 %v3137_v13  ;;  %2008 = vmatprep.mubr.bf16.mxu1 %v3162_v36  ;;  %v3167_v41 = vld [vmem:[%s4184_s1 + $0x130] sm:$0xff]   ;;  %v3170_v44 = vld [vmem:[%s4184_s1 + $0x168] sm:$0xff]   ;;  %v3174_v48 = vld [vmem:[%s4184_s1 + $0x160] sm:$0xff]  }
  0x22   : > { %2795 = vmatprep.subr.bf16.mxu0 %v3140_v16  ;;  %v3168_v42 = vld [vmem:[%s4184_s1 + $0x1f0] sm:$0xff]   ;;  %v3171_v45 = vld [vmem:[%s4184_s1 + $0x128] sm:$0xff]   ;;  %v3175_v49 = vld [vmem:[%s4184_s1 + $0x120] sm:$0xff]  }
  0x23   : > { %2816 = vmatpush3.bf16.msra.mxu1 %v3139_v15  ;;  %v3169_v43 = vld [vmem:[%s4184_s1 + $0x1b0] sm:$0xff]   ;;  %v3172_v46 = vld [vmem:[%s4184_s1 + $0x1e8] sm:$0xff]   ;;  %v3176_v50 = vld [vmem:[%s4184_s1 + $0x1e0] sm:$0xff]  }
  0x24   : > { %2817 = vmatprep.subr.bf16.mxu1 %v3142_v18  ;;  %v3173_v47 = vld [vmem:[%s4184_s1 + $0x1a8] sm:$0xff]   ;;  %v3177_v51 = vld [vmem:[%s4184_s1 + $0x1a0] sm:$0xff]   ;;  %v3179_v53 = vld [vmem:[%s4184_s1 + $0x118] sm:$0xff]  }
  0x25   : > { %2796 = vmatpush3.bf16.msra.mxu0 %v3141_v17  ;;  %v3180_v54 = vld [vmem:[%s4184_s1 + $0x1d8] sm:$0xff]   ;;  %v3182_v56 = vld [vmem:[%s4184_s1 + $0x150] sm:$0xff]   ;;  %v3186_v60 = vld [vmem:[%s4184_s1 + $0x148] sm:$0xff]  }
  0x26   : > { %2797 = vmatprep.subr.bf16.mxu0 %v3144_v20  ;;  %v3181_v55 = vld [vmem:[%s4184_s1 + $0x198] sm:$0xff]   ;;  %v3183_v57 = vld [vmem:[%s4184_s1 + $0x110] sm:$0xff]   ;;  %v3187_v61 = vld [vmem:[%s4184_s1 + $0x108] sm:$0xff]  }
  0x27   : > { %2818 = vmatpush3.bf16.msra.mxu1 %v3143_v19  ;;  %v3184_v58 = vld [vmem:[%s4184_s1 + $0x1d0] sm:$0xff]   ;;  %v3188_v62 = vld [vmem:[%s4184_s1 + $0x1c8] sm:$0xff]   ;;  %v3190_v0 = vld [vmem:[%s4184_s1 + $0x140] sm:$0xff]  }
  0x28   : > { %2819 = vmatprep.subr.bf16.mxu1 %v3146_v22  ;;  %v3185_v59 = vld [vmem:[%s4184_s1 + $0x190] sm:$0xff]   ;;  %v3189_v63 = vld [vmem:[%s4184_s1 + $0x188] sm:$0xff]   ;;  %v3191_v1 = vld [vmem:[%s4184_s1 + $0x100] sm:$0xff]  }
  0x29   : > { %2798 = vmatpush3.bf16.msra.mxu0 %v3145_v21  ;;  %v3192_v2 = vld [vmem:[%s4184_s1 + $0x1c0] sm:$0xff]   ;;  %v3193_v3 = vld [vmem:[%s3591_s5 + $0x10] ss:$100 sps:$4 sm:$0xff]   ;;  %v3197_v6 = vld [vmem:[%s4184_s1 + $0x278] sm:$0xff]  }
  0x2a   : > { %2799 = vmatprep.subr.bf16.mxu0 %v3148_v24  ;;  %v3195_v4 = vld [vmem:[%s3591_s5 + $0x14] ss:$100 sps:$4 sm:$0xff]   ;;  %v3196_v5 = vld [vmem:[%s4184_s1 + $0x180] sm:$0xff]   ;;  %v3208_v16 = vld [vmem:[%s4184_s1 + $0x268] sm:$0xff]  }
  0x2b   : > { %2820 = vmatpush3.bf16.msra.mxu1 %v3147_v23  ;;  %v3198_v7 = vld [vmem:[%s3591_s5 + $0x18] ss:$100 sps:$4 sm:$0xff]   ;;  %v3204_v12 = vld [vmem:[%s4184_s1 + $0x270] sm:$0xff]   ;;  %v3209_v17 = vld [vmem:[%s4184_s1 + $0x228] sm:$0xff]  }
  0x2c   : > { %2821 = vmatprep.subr.bf16.mxu1 %v3150_v26  ;;  %v3200_v8 = vld [vmem:[%s3591_s5 + $0x1c] ss:$100 sps:$4 sm:$0xff]   ;;  %v3205_v13 = vld [vmem:[%s4184_s1 + $0x230] sm:$0xff]   ;;  %v3210_v18 = vld [vmem:[%s4184_s1 + $0x2e8] sm:$0xff]  }
  0x2d   : > { %2800 = vmatpush3.bf16.msra.mxu0 %v3149_v25  ;;  %v3201_v9 = vld [vmem:[%s4184_s1 + $0x238] sm:$0xff]   ;;  %v3206_v14 = vld [vmem:[%s4184_s1 + $0x2f0] sm:$0xff]   ;;  %v3211_v19 = vld [vmem:[%s4184_s1 + $0x2a8] sm:$0xff]  }
  0x2e   : > { %2801 = vmatprep.subr.bf16.mxu0 %v3152_v28  ;;  %v3202_v10 = vld [vmem:[%s4184_s1 + $0x2f8] sm:$0xff]   ;;  %v3207_v15 = vld [vmem:[%s4184_s1 + $0x2b0] sm:$0xff]   ;;  %v3212_v20 = vld [vmem:[%s4184_s1 + $0x260] sm:$0xff]  }
  0x2f   : > { %2822 = vmatpush3.bf16.msra.mxu1 %v3151_v27  ;;  %v3203_v11 = vld [vmem:[%s4184_s1 + $0x2b8] sm:$0xff]   ;;  %v3213_v21 = vld [vmem:[%s4184_s1 + $0x220] sm:$0xff]   ;;  %v3220_v28 = vld [vmem:[%s4184_s1 + $0x250] sm:$0xff]  }
  0x30   : > { %2823 = vmatprep.subr.bf16.mxu1 %v3154_v30  ;;  %v3214_v22 = vld [vmem:[%s4184_s1 + $0x2e0] sm:$0xff]   ;;  %v3216_v24 = vld [vmem:[%s4184_s1 + $0x258] sm:$0xff]   ;;  %v3222_v30 = vld [vmem:[%s4184_s1 + $0x2d0] sm:$0xff]  }
  0x31   : > { %2802 = vmatpush3.bf16.msra.mxu0 %v3153_v29  ;;  %v3215_v23 = vld [vmem:[%s4184_s1 + $0x2a0] sm:$0xff]   ;;  %v3217_v25 = vld [vmem:[%s4184_s1 + $0x218] sm:$0xff]   ;;  %v3221_v29 = vld [vmem:[%s4184_s1 + $0x210] sm:$0xff]  }
  0x32   : > { %2831 = vmatprep.subr.bf16.mxu0 %v3159_v34  ;;  %v3218_v26 = vld [vmem:[%s4184_s1 + $0x2d8] sm:$0xff]   ;;  %v3224_v32 = vld [vmem:[%s4184_s1 + $0x248] sm:$0xff]   ;;  %v3228_v36 = vld [vmem:[%s4184_s1 + $0x240] sm:$0xff]  }
  0x33   : > { %2824 = vmatpush3.bf16.msra.mxu1 %v3158_v33  ;;  %v3219_v27 = vld [vmem:[%s4184_s1 + $0x298] sm:$0xff]   ;;  %v3225_v33 = vld [vmem:[%s4184_s1 + $0x208] sm:$0xff]  }
  0x34   : > { %1968 = vmatmul.mubr.bf16.vlgmr.msra.gmra.mxu0 %v3155_v31  ;;  %2853 = vmatprep.subr.bf16.mxu1 %v3164_v38  ;;  %v3223_v31 = vld [vmem:[%s4184_s1 + $0x290] sm:$0xff]   ;;  %v3226_v34 = vld [vmem:[%s4184_s1 + $0x2c8] sm:$0xff]   ;;  %v3230_v38 = vld [vmem:[%s4184_s1 + $0x2c0] sm:$0xff]  }
  0x35   : > { %2832 = vmatpush3.bf16.msra.mxu0 %v3163_v37  ;;  %2049 = vmatprep.mubr.bf16.mxu0 %v3195_v4  ;;  %v3229_v37 = vld [vmem:[%s4184_s1 + $0x200] sm:$0xff]   ;;  %v3262_v4 = vld [vmem:[%s4184_s1 + $0x348] sm:$0xff]  }
  0x36   : > { %2009 = vmatmul.mubr.bf16.vlgmr.msra.gmra.mxu1 %v3160_v35  ;;  %2833 = vmatprep.subr.bf16.mxu0 %v3166_v40  ;;  %v3227_v35 = vld [vmem:[%s4184_s1 + $0x288] sm:$0xff]  }
  0x37   : > { %2854 = vmatpush3.bf16.msra.mxu1 %v3165_v39  ;;  %2090 = vmatprep.mubr.bf16.mxu1 %v3200_v8  ;;  %v3231_v39 = vld [vmem:[%s3591_s5 + $0x20] ss:$100 sps:$4 sm:$0xff]  }
  0x38   : > { %2855 = vmatprep.subr.bf16.mxu1 %v3168_v42  ;;  %v3233_v40 = vld [vmem:[%s3591_s5 + $0x24] ss:$100 sps:$4 sm:$0xff]   ;;  %v3235_v42 = vld [vmem:[%s4184_s1 + $0x378] sm:$0xff]  }
  0x39   : > { %2834 = vmatpush3.bf16.msra.mxu0 %v3167_v41  ;;  %v3234_v41 = vld [vmem:[%s4184_s1 + $0x280] sm:$0xff]  }
  0x3a   : > { %2835 = vmatprep.subr.bf16.mxu0 %v3170_v44  ;;  %v3238_v44 = vld [vmem:[%s3591_s5 + $0x2c] ss:$100 sps:$4 sm:$0xff]   ;;  %v3266_v8 = vld [vmem:[%s4184_s1 + $0x340] sm:$0xff]  }
  0x3b   : > { %2856 = vmatpush3.bf16.msra.mxu1 %v3169_v43  ;;  %v3236_v43 = vld [vmem:[%s3591_s5 + $0x28] ss:$100 sps:$4 sm:$0xff]  }
  0x3c   : > { %2857 = vmatprep.subr.bf16.mxu1 %v3172_v46  ;;  %v3240_v46 = vld [vmem:[%s4184_s1 + $0x3f8] sm:$0xff]  }
  0x3d   : > { %2836 = vmatpush3.bf16.msra.mxu0 %v3171_v45  ;;  %v3239_v45 = vld [vmem:[%s4184_s1 + $0x338] sm:$0xff]  }
  0x3e   : > { %2837 = vmatprep.subr.bf16.mxu0 %v3174_v48  ;;  %v3242_v48 = vld [vmem:[%s4184_s1 + $0x370] sm:$0xff]  }
  0x3f   : > { %2858 = vmatpush3.bf16.msra.mxu1 %v3173_v47  ;;  %v3241_v47 = vld [vmem:[%s4184_s1 + $0x3b8] sm:$0xff]  }
  0x40   : > { %2859 = vmatprep.subr.bf16.mxu1 %v3176_v50  ;;  %v3244_v50 = vld [vmem:[%s4184_s1 + $0x3f0] sm:$0xff]  }
  0x41   : > { %2838 = vmatpush3.bf16.msra.mxu0 %v3175_v49  ;;  %v3243_v49 = vld [vmem:[%s4184_s1 + $0x330] sm:$0xff]  }
  0x42   : > { %2839 = vmatprep.subr.bf16.mxu0 %v3178_v52  ;;  %v3246_v52 = vld [vmem:[%s4184_s1 + $0x368] sm:$0xff]  }
  0x43   : > { %2860 = vmatpush3.bf16.msra.mxu1 %v3177_v51  ;;  %v3245_v51 = vld [vmem:[%s4184_s1 + $0x3b0] sm:$0xff]  }
  0x44   : > { %2861 = vmatprep.subr.bf16.mxu1 %v3180_v54  ;;  %v3248_v54 = vld [vmem:[%s4184_s1 + $0x3e8] sm:$0xff]  }
  0x45   : > { %2840 = vmatpush3.bf16.msra.mxu0 %v3179_v53  ;;  %v3247_v53 = vld [vmem:[%s4184_s1 + $0x328] sm:$0xff]  }
  0x46   : > { %2841 = vmatprep.subr.bf16.mxu0 %v3182_v56  ;;  %v3250_v56 = vld [vmem:[%s4184_s1 + $0x360] sm:$0xff]  }
  0x47   : > { %2862 = vmatpush3.bf16.msra.mxu1 %v3181_v55  ;;  %v3249_v55 = vld [vmem:[%s4184_s1 + $0x3a8] sm:$0xff]  }
  0x48   : > { %2863 = vmatprep.subr.bf16.mxu1 %v3184_v58  ;;  %v3252_v58 = vld [vmem:[%s4184_s1 + $0x3e0] sm:$0xff]  }
  0x49   : > { %2842 = vmatpush3.bf16.msra.mxu0 %v3183_v57  ;;  %v3251_v57 = vld [vmem:[%s4184_s1 + $0x320] sm:$0xff]  }
  0x4a   : > { %2843 = vmatprep.subr.bf16.mxu0 %v3186_v60  ;;  %v3254_v60 = vld [vmem:[%s4184_s1 + $0x358] sm:$0xff]  }
  0x4b   : > { %2864 = vmatpush3.bf16.msra.mxu1 %v3185_v59  ;;  %v3253_v59 = vld [vmem:[%s4184_s1 + $0x3a0] sm:$0xff]  }
  0x4c   : > { %2865 = vmatprep.subr.bf16.mxu1 %v3188_v62  ;;  %v3256_v62 = vld [vmem:[%s4184_s1 + $0x3d8] sm:$0xff]  }
  0x4d   : > { %2844 = vmatpush3.bf16.msra.mxu0 %v3187_v61  ;;  %v3255_v61 = vld [vmem:[%s4184_s1 + $0x318] sm:$0xff]  }
  0x4e   : > { %2845 = vmatprep.subr.bf16.mxu0 %v3190_v0  ;;  %v3258_v0 = vld [vmem:[%s4184_s1 + $0x350] sm:$0xff]  }
  0x4f   : > { %2866 = vmatpush3.bf16.msra.mxu1 %v3189_v63  ;;  %v3257_v63 = vld [vmem:[%s4184_s1 + $0x398] sm:$0xff]  }
  0x50   : > { %2867 = vmatprep.subr.bf16.mxu1 %v3192_v2  ;;  %v3260_v2 = vld [vmem:[%s4184_s1 + $0x3d0] sm:$0xff]  }
  0x51   : > { %2846 = vmatpush3.bf16.msra.mxu0 %v3191_v1  ;;  %v3259_v1 = vld [vmem:[%s4184_s1 + $0x310] sm:$0xff]  }
  0x52   : > { %2875 = vmatprep.subr.bf16.mxu0 %v3197_v6  ;;  %v3264_v6 = vld [vmem:[%s4184_s1 + $0x3c8] sm:$0xff]  }
  0x53   : > { %2868 = vmatpush3.bf16.msra.mxu1 %v3196_v5  ;;  %v3263_v5 = vld [vmem:[%s4184_s1 + $0x308] sm:$0xff]  }
  0x54   : > { %2050 = vmatmul.mubr.bf16.vlgmr.msra.gmra.mxu0 %v3193_v3  ;;  %2897 = vmatprep.subr.bf16.mxu1 %v3202_v10  ;;  %v3261_v3 = vld [vmem:[%s4184_s1 + $0x390] sm:$0xff]   ;;  %v3268_v10 = vld [vmem:[%s4184_s1 + $0x3c0] sm:$0xff]  }
  0x55   : > { %2876 = vmatpush3.bf16.msra.mxu0 %v3201_v9  ;;  %2131 = vmatprep.mubr.bf16.mxu0 %v3233_v40  ;;  %v3267_v9 = vld [vmem:[%s4184_s1 + $0x300] sm:$0xff]   ;;  %v3300_v40 = vld [vmem:[%s4184_s1 + $0x448] sm:$0xff]  }
  0x56   : > { %2091 = vmatmul.mubr.bf16.vlgmr.msra.gmra.mxu1 %v3198_v7  ;;  %2877 = vmatprep.subr.bf16.mxu0 %v3204_v12  ;;  %v3265_v7 = vld [vmem:[%s4184_s1 + $0x388] sm:$0xff]   ;;  %v3271_v12 = vld [vmem:[%s3591_s5 + $0x34] ss:$100 sps:$4 sm:$0xff]  }
  0x57   : > { %2898 = vmatpush3.bf16.msra.mxu1 %v3203_v11  ;;  %2172 = vmatprep.mubr.bf16.mxu1 %v3238_v44  ;;  %v3269_v11 = vld [vmem:[%s3591_s5 + $0x30] ss:$100 sps:$4 sm:$0xff]   ;;  %v3304_v44 = vld [vmem:[%s4184_s1 + $0x440] sm:$0xff]  }
  0x58   : > { %2899 = vmatprep.subr.bf16.mxu1 %v3206_v14  ;;  %v3273_v14 = vld [vmem:[%s4184_s1 + $0x478] sm:$0xff]  }
  0x59   : > { %2878 = vmatpush3.bf16.msra.mxu0 %v3205_v13  ;;  %v3272_v13 = vld [vmem:[%s4184_s1 + $0x380] sm:$0xff]  }
  0x5a   : > { %2879 = vmatprep.subr.bf16.mxu0 %v3208_v16  ;;  %v3276_v16 = vld [vmem:[%s3591_s5 + $0x3c] ss:$100 sps:$4 sm:$0xff]  }
  0x5b   : > { %2900 = vmatpush3.bf16.msra.mxu1 %v3207_v15  ;;  %v3274_v15 = vld [vmem:[%s3591_s5 + $0x38] ss:$100 sps:$4 sm:$0xff]  }
  0x5c   : > { %2901 = vmatprep.subr.bf16.mxu1 %v3210_v18  ;;  %v3278_v18 = vld [vmem:[%s4184_s1 + $0x4f8] sm:$0xff]  }
  0x5d   : > { %2880 = vmatpush3.bf16.msra.mxu0 %v3209_v17  ;;  %v3277_v17 = vld [vmem:[%s4184_s1 + $0x438] sm:$0xff]  }
  0x5e   : > { %2881 = vmatprep.subr.bf16.mxu0 %v3212_v20  ;;  %v3280_v20 = vld [vmem:[%s4184_s1 + $0x470] sm:$0xff]  }
  0x5f   : > { %2902 = vmatpush3.bf16.msra.mxu1 %v3211_v19  ;;  %v3279_v19 = vld [vmem:[%s4184_s1 + $0x4b8] sm:$0xff]  }
  0x60   : > { %2903 = vmatprep.subr.bf16.mxu1 %v3214_v22  ;;  %v3282_v22 = vld [vmem:[%s4184_s1 + $0x4f0] sm:$0xff]  }
  0x61   : > { %2882 = vmatpush3.bf16.msra.mxu0 %v3213_v21  ;;  %v3281_v21 = vld [vmem:[%s4184_s1 + $0x430] sm:$0xff]  }
  0x62   : > { %2883 = vmatprep.subr.bf16.mxu0 %v3216_v24  ;;  %v3284_v24 = vld [vmem:[%s4184_s1 + $0x468] sm:$0xff]  }
  0x63   : > { %2904 = vmatpush3.bf16.msra.mxu1 %v3215_v23  ;;  %v3283_v23 = vld [vmem:[%s4184_s1 + $0x4b0] sm:$0xff]  }
  0x64   : > { %2905 = vmatprep.subr.bf16.mxu1 %v3218_v26  ;;  %v3286_v26 = vld [vmem:[%s4184_s1 + $0x4e8] sm:$0xff]  }
  0x65   : > { %2884 = vmatpush3.bf16.msra.mxu0 %v3217_v25  ;;  %v3285_v25 = vld [vmem:[%s4184_s1 + $0x428] sm:$0xff]  }
  0x66   : > { %2885 = vmatprep.subr.bf16.mxu0 %v3220_v28  ;;  %v3288_v28 = vld [vmem:[%s4184_s1 + $0x460] sm:$0xff]  }
  0x67   : > { %2906 = vmatpush3.bf16.msra.mxu1 %v3219_v27  ;;  %v3287_v27 = vld [vmem:[%s4184_s1 + $0x4a8] sm:$0xff]  }
  0x68   : > { %2907 = vmatprep.subr.bf16.mxu1 %v3222_v30  ;;  %v3290_v30 = vld [vmem:[%s4184_s1 + $0x4e0] sm:$0xff]  }
  0x69   : > { %2886 = vmatpush3.bf16.msra.mxu0 %v3221_v29  ;;  %v3289_v29 = vld [vmem:[%s4184_s1 + $0x420] sm:$0xff]  }
  0x6a   : > { %2887 = vmatprep.subr.bf16.mxu0 %v3224_v32  ;;  %v3292_v32 = vld [vmem:[%s4184_s1 + $0x458] sm:$0xff]  }
  0x6b   : > { %2908 = vmatpush3.bf16.msra.mxu1 %v3223_v31  ;;  %v3291_v31 = vld [vmem:[%s4184_s1 + $0x4a0] sm:$0xff]  }
  0x6c   : > { %2909 = vmatprep.subr.bf16.mxu1 %v3226_v34  ;;  %v3294_v34 = vld [vmem:[%s4184_s1 + $0x4d8] sm:$0xff]  }
  0x6d   : > { %2888 = vmatpush3.bf16.msra.mxu0 %v3225_v33  ;;  %v3293_v33 = vld [vmem:[%s4184_s1 + $0x418] sm:$0xff]  }
  0x6e   : > { %2889 = vmatprep.subr.bf16.mxu0 %v3228_v36  ;;  %v3296_v36 = vld [vmem:[%s4184_s1 + $0x450] sm:$0xff]  }
  0x6f   : > { %2910 = vmatpush3.bf16.msra.mxu1 %v3227_v35  ;;  %v3295_v35 = vld [vmem:[%s4184_s1 + $0x498] sm:$0xff]  }
  0x70   : > { %2911 = vmatprep.subr.bf16.mxu1 %v3230_v38  ;;  %v3298_v38 = vld [vmem:[%s4184_s1 + $0x4d0] sm:$0xff]  }
  0x71   : > { %2890 = vmatpush3.bf16.msra.mxu0 %v3229_v37  ;;  %v3297_v37 = vld [vmem:[%s4184_s1 + $0x410] sm:$0xff]  }
  0x72   : > { %2919 = vmatprep.subr.bf16.mxu0 %v3235_v42  ;;  %v3302_v42 = vld [vmem:[%s4184_s1 + $0x4c8] sm:$0xff]  }
  0x73   : > { %2912 = vmatpush3.bf16.msra.mxu1 %v3234_v41  ;;  %v3301_v41 = vld [vmem:[%s4184_s1 + $0x408] sm:$0xff]  }
  0x74   : > { %2132 = vmatmul.mubr.bf16.vlgmr.msra.gmra.mxu0 %v3231_v39  ;;  %2941 = vmatprep.subr.bf16.mxu1 %v3240_v46  ;;  %v3299_v39 = vld [vmem:[%s4184_s1 + $0x490] sm:$0xff]   ;;  %v3306_v46 = vld [vmem:[%s4184_s1 + $0x4c0] sm:$0xff]  }
  0x75   : > { %2920 = vmatpush3.bf16.msra.mxu0 %v3239_v45  ;;  %2213 = vmatprep.mubr.bf16.mxu0 %v3271_v12  ;;  %v3305_v45 = vld [vmem:[%s4184_s1 + $0x400] sm:$0xff]   ;;  %v3338_v12 = vld [vmem:[%s4184_s1 + $0x548] sm:$0xff]  }
  0x76   : > { %2173 = vmatmul.mubr.bf16.vlgmr.msra.gmra.mxu1 %v3236_v43  ;;  %2921 = vmatprep.subr.bf16.mxu0 %v3242_v48  ;;  %v3303_v43 = vld [vmem:[%s4184_s1 + $0x488] sm:$0xff]  }
  0x77   : > { %2942 = vmatpush3.bf16.msra.mxu1 %v3241_v47  ;;  %2254 = vmatprep.mubr.bf16.mxu1 %v3276_v16  ;;  %v3307_v47 = vld [vmem:[%s3591_s5 + $0x40] ss:$100 sps:$4 sm:$0xff]  }
  0x78   : > { %2943 = vmatprep.subr.bf16.mxu1 %v3244_v50  ;;  %v3309_v48 = vld [vmem:[%s3591_s5 + $0x44] ss:$100 sps:$4 sm:$0xff]   ;;  %v3311_v50 = vld [vmem:[%s4184_s1 + $0x578] sm:$0xff]  }
  0x79   : > { %2922 = vmatpush3.bf16.msra.mxu0 %v3243_v49  ;;  %v3310_v49 = vld [vmem:[%s4184_s1 + $0x480] sm:$0xff]  }
  0x7a   : > { %2923 = vmatprep.subr.bf16.mxu0 %v3246_v52  ;;  %v3314_v52 = vld [vmem:[%s3591_s5 + $0x4c] ss:$100 sps:$4 sm:$0xff]   ;;  %v3342_v16 = vld [vmem:[%s4184_s1 + $0x540] sm:$0xff]  }
  0x7b   : > { %2944 = vmatpush3.bf16.msra.mxu1 %v3245_v51  ;;  %v3312_v51 = vld [vmem:[%s3591_s5 + $0x48] ss:$100 sps:$4 sm:$0xff]  }
  0x7c   : > { %2945 = vmatprep.subr.bf16.mxu1 %v3248_v54  ;;  %v3316_v54 = vld [vmem:[%s4184_s1 + $0x5f8] sm:$0xff]  }
  0x7d   : > { %2924 = vmatpush3.bf16.msra.mxu0 %v3247_v53  ;;  %v3315_v53 = vld [vmem:[%s4184_s1 + $0x538] sm:$0xff]  }
  0x7e   : > { %2925 = vmatprep.subr.bf16.mxu0 %v3250_v56  ;;  %v3318_v56 = vld [vmem:[%s4184_s1 + $0x570] sm:$0xff]  }
  0x7f   : > { %2946 = vmatpush3.bf16.msra.mxu1 %v3249_v55  ;;  %v3317_v55 = vld [vmem:[%s4184_s1 + $0x5b8] sm:$0xff]  }
  0x80   : > { %2947 = vmatprep.subr.bf16.mxu1 %v3252_v58  ;;  %v3320_v58 = vld [vmem:[%s4184_s1 + $0x5f0] sm:$0xff]  }
  0x81   : > { %2926 = vmatpush3.bf16.msra.mxu0 %v3251_v57  ;;  %v3319_v57 = vld [vmem:[%s4184_s1 + $0x530] sm:$0xff]  }
  0x82   : > { %2927 = vmatprep.subr.bf16.mxu0 %v3254_v60  ;;  %v3322_v60 = vld [vmem:[%s4184_s1 + $0x568] sm:$0xff]  }
  0x83   : > { %2948 = vmatpush3.bf16.msra.mxu1 %v3253_v59  ;;  %v3321_v59 = vld [vmem:[%s4184_s1 + $0x5b0] sm:$0xff]  }
  0x84   : > { %2949 = vmatprep.subr.bf16.mxu1 %v3256_v62  ;;  %v3324_v62 = vld [vmem:[%s4184_s1 + $0x5e8] sm:$0xff]  }
  0x85   : > { %2928 = vmatpush3.bf16.msra.mxu0 %v3255_v61  ;;  %v3323_v61 = vld [vmem:[%s4184_s1 + $0x528] sm:$0xff]  }
  0x86   : > { %2929 = vmatprep.subr.bf16.mxu0 %v3258_v0  ;;  %v3326_v0 = vld [vmem:[%s4184_s1 + $0x560] sm:$0xff]  }
  0x87   : > { %2950 = vmatpush3.bf16.msra.mxu1 %v3257_v63  ;;  %v3325_v63 = vld [vmem:[%s4184_s1 + $0x5a8] sm:$0xff]  }
  0x88   : > { %2951 = vmatprep.subr.bf16.mxu1 %v3260_v2  ;;  %v3328_v2 = vld [vmem:[%s4184_s1 + $0x5e0] sm:$0xff]  }
  0x89   : > { %2930 = vmatpush3.bf16.msra.mxu0 %v3259_v1  ;;  %v3327_v1 = vld [vmem:[%s4184_s1 + $0x520] sm:$0xff]  }
  0x8a   : > { %2931 = vmatprep.subr.bf16.mxu0 %v3262_v4  ;;  %v3330_v4 = vld [vmem:[%s4184_s1 + $0x558] sm:$0xff]  }
  0x8b   : > { %2952 = vmatpush3.bf16.msra.mxu1 %v3261_v3  ;;  %v3329_v3 = vld [vmem:[%s4184_s1 + $0x5a0] sm:$0xff]  }
  0x8c   : > { %2953 = vmatprep.subr.bf16.mxu1 %v3264_v6  ;;  %v3332_v6 = vld [vmem:[%s4184_s1 + $0x5d8] sm:$0xff]  }
  0x8d   : > { %2932 = vmatpush3.bf16.msra.mxu0 %v3263_v5  ;;  %v3331_v5 = vld [vmem:[%s4184_s1 + $0x518] sm:$0xff]  }
  0x8e   : > { %2933 = vmatprep.subr.bf16.mxu0 %v3266_v8  ;;  %v3334_v8 = vld [vmem:[%s4184_s1 + $0x550] sm:$0xff]  }
  0x8f   : > { %2954 = vmatpush3.bf16.msra.mxu1 %v3265_v7  ;;  %v3333_v7 = vld [vmem:[%s4184_s1 + $0x598] sm:$0xff]  }
  0x90   : > { %2955 = vmatprep.subr.bf16.mxu1 %v3268_v10  ;;  %v3336_v10 = vld [vmem:[%s4184_s1 + $0x5d0] sm:$0xff]  }
  0x91   : > { %2934 = vmatpush3.bf16.msra.mxu0 %v3267_v9  ;;  %v3335_v9 = vld [vmem:[%s4184_s1 + $0x510] sm:$0xff]  }
  0x92   : > { %2963 = vmatprep.subr.bf16.mxu0 %v3273_v14  ;;  %v3340_v14 = vld [vmem:[%s4184_s1 + $0x5c8] sm:$0xff]  }
  0x93   : > { %2956 = vmatpush3.bf16.msra.mxu1 %v3272_v13  ;;  %v3339_v13 = vld [vmem:[%s4184_s1 + $0x508] sm:$0xff]  }
  0x94   : > { %2214 = vmatmul.mubr.bf16.vlgmr.msra.gmra.mxu0 %v3269_v11  ;;  %2985 = vmatprep.subr.bf16.mxu1 %v3278_v18  ;;  %v3337_v11 = vld [vmem:[%s4184_s1 + $0x590] sm:$0xff]   ;;  %v3344_v18 = vld [vmem:[%s4184_s1 + $0x5c0] sm:$0xff]  }
  0x95   : > { %2964 = vmatpush3.bf16.msra.mxu0 %v3277_v17  ;;  %2295 = vmatprep.mubr.bf16.mxu0 %v3309_v48  ;;  %v3343_v17 = vld [vmem:[%s4184_s1 + $0x500] sm:$0xff]  }
  0x96   : > { %2255 = vmatmul.mubr.bf16.vlgmr.msra.gmra.mxu1 %v3274_v15  ;;  %2965 = vmatprep.subr.bf16.mxu0 %v3280_v20  ;;  %v3341_v15 = vld [vmem:[%s4184_s1 + $0x588] sm:$0xff]   ;;  %v3347_v20 = vld [vmem:[%s3591_s5 + $0x54] ss:$100 sps:$4 sm:$0xff]  }
  0x97   : > { %2986 = vmatpush3.bf16.msra.mxu1 %v3279_v19  ;;  %2336 = vmatprep.mubr.bf16.mxu1 %v3314_v52  ;;  %v3345_v19 = vld [vmem:[%s3591_s5 + $0x50] ss:$100 sps:$4 sm:$0xff]  }
  0x98   : > { %2987 = vmatprep.subr.bf16.mxu1 %v3282_v22  ;;  %v3427_v22 = vmov 0.0  }
  0x99   : > { %2966 = vmatpush3.bf16.msra.mxu0 %v3281_v21  ;;  %v3348_v21 = vld [vmem:[%s4184_s1 + $0x580] sm:$0xff]  }
  0x9a   : > { %2967 = vmatprep.subr.bf16.mxu0 %v3284_v24  ;;  %v3351_v24 = vld [vmem:[%s3591_s5 + $0x5c] ss:$100 sps:$4 sm:$0xff]  }
  0x9b   : > { %2988 = vmatpush3.bf16.msra.mxu1 %v3283_v23  ;;  %v3349_v23 = vld [vmem:[%s3591_s5 + $0x58] ss:$100 sps:$4 sm:$0xff]  }
  0x9c   : > { %2989 = vmatprep.subr.bf16.mxu1 %v3286_v26  ;;  %v3353_v26 = vld [vmem:[%s4184_s1 + $0x630] sm:$0xff]  }
  0x9d   : > { %2968 = vmatpush3.bf16.msra.mxu0 %v3285_v25  ;;  %v3352_v25 = vld [vmem:[%s4184_s1 + $0x638] sm:$0xff]  }
  0x9e   : > { %2969 = vmatprep.subr.bf16.mxu0 %v3288_v28  ;;  %v3355_v28 = vld [vmem:[%s4184_s1 + $0x620] sm:$0xff]  }
  0x9f   : > { %2990 = vmatpush3.bf16.msra.mxu1 %v3287_v27  ;;  %v3354_v27 = vld [vmem:[%s4184_s1 + $0x628] sm:$0xff]  }
  0xa0   : > { %2991 = vmatprep.subr.bf16.mxu1 %v3290_v30  ;;  %v3357_v30 = vld [vmem:[%s4184_s1 + $0x610] sm:$0xff]  }
  0xa1   : > { %2970 = vmatpush3.bf16.msra.mxu0 %v3289_v29  ;;  %v3356_v29 = vld [vmem:[%s4184_s1 + $0x618] sm:$0xff]  }
  0xa2   : > { %2971 = vmatprep.subr.bf16.mxu0 %v3292_v32  ;;  %v3359_v32 = vld [vmem:[%s4184_s1 + $0x600] sm:$0xff]  }
  0xa3   : > { %2992 = vmatpush3.bf16.msra.mxu1 %v3291_v31  ;;  %v3358_v31 = vld [vmem:[%s4184_s1 + $0x608] sm:$0xff]  }
  0xa4   : > { %2993 = vmatprep.subr.bf16.mxu1 %v3294_v34 }
  0xa5   : > { %2972 = vmatpush3.bf16.msra.mxu0 %v3293_v33  ;;  %v3360_v33 = vld [vmem:[%s3591_s5 + $0x60] ss:$100 sps:$4 sm:$0xff]  }
  0xa6   : > { %2973 = vmatprep.subr.bf16.mxu0 %v3296_v36 }
  0xa7   : > { %2994 = vmatpush3.bf16.msra.mxu1 %v3295_v35 }
  0xa8   : > { %2995 = vmatprep.subr.bf16.mxu1 %v3298_v38 }
  0xa9   : > { %2974 = vmatpush3.bf16.msra.mxu0 %v3297_v37 }
  0xaa   : > { %2975 = vmatprep.subr.bf16.mxu0 %v3300_v40 }
  0xab   : > { %2996 = vmatpush3.bf16.msra.mxu1 %v3299_v39 }
  0xac   : > { %2997 = vmatprep.subr.bf16.mxu1 %v3302_v42 }
  0xad   : > { %2976 = vmatpush3.bf16.msra.mxu0 %v3301_v41 }
  0xae   : > { %2977 = vmatprep.subr.bf16.mxu0 %v3304_v44 }
  0xaf   : > { %2998 = vmatpush3.bf16.msra.mxu1 %v3303_v43 }
  0xb0   : > { %2999 = vmatprep.subr.bf16.mxu1 %v3306_v46 }
  0xb1   : > { %2978 = vmatpush3.bf16.msra.mxu0 %v3305_v45 }
  0xb2   : > { %3007 = vmatprep.subr.bf16.mxu0 %v3311_v50 }
  0xb3   : > { %3000 = vmatpush3.bf16.msra.mxu1 %v3310_v49 }
  0xb4   : > { %2296 = vmatmul.mubr.bf16.vlgmr.msra.gmra.mxu0 %v3307_v47  ;;  %3029 = vmatprep.subr.bf16.mxu1 %v3316_v54 }
  0xb5   : > { %3008 = vmatpush3.bf16.msra.mxu0 %v3315_v53  ;;  %2377 = vmatprep.mubr.bf16.mxu0 %v3347_v20 }
  0xb6   : > { %2337 = vmatmul.mubr.bf16.vlgmr.msra.gmra.mxu1 %v3312_v51  ;;  %3009 = vmatprep.subr.bf16.mxu0 %v3318_v56 }
  0xb7   : > { %3030 = vmatpush3.bf16.msra.mxu1 %v3317_v55  ;;  %2418 = vmatprep.mubr.bf16.mxu1 %v3351_v24 }
  0xb8   : > { %3031 = vmatprep.subr.bf16.mxu1 %v3320_v58 }
  0xb9   : > { %3010 = vmatpush3.bf16.msra.mxu0 %v3319_v57 }
  0xba   : > { %3011 = vmatprep.subr.bf16.mxu0 %v3322_v60 }
  0xbb   : > { %3032 = vmatpush3.bf16.msra.mxu1 %v3321_v59 }
  0xbc   : > { %3033 = vmatprep.subr.bf16.mxu1 %v3324_v62 }
  0xbd   : > { %3012 = vmatpush3.bf16.msra.mxu0 %v3323_v61 }
  0xbe   : > { %3013 = vmatprep.subr.bf16.mxu0 %v3326_v0  ;;  %v2555_v0 = vld [vmem:[%s4185_s2] ss:$0 sm:$0xff] }
  0xbf   : > { %3034 = vmatpush3.bf16.msra.mxu1 %v3325_v63 }
  0xc0   : > { %3035 = vmatprep.subr.bf16.mxu1 %v3328_v2 }
  0xc1   : > { %3014 = vmatpush3.bf16.msra.mxu0 %v3327_v1 }
  0xc2   : > { %3015 = vmatprep.subr.bf16.mxu0 %v3330_v4 }
  0xc3   : > { %3036 = vmatpush3.bf16.msra.mxu1 %v3329_v3 }
  0xc4   : > { %3037 = vmatprep.subr.bf16.mxu1 %v3332_v6 }
  0xc5   : > { %3016 = vmatpush3.bf16.msra.mxu0 %v3331_v5 }
  0xc6   : > { %3017 = vmatprep.subr.bf16.mxu0 %v3334_v8 }
  0xc7   : > { %3038 = vmatpush3.bf16.msra.mxu1 %v3333_v7 }
  0xc8   : > { %3039 = vmatprep.subr.bf16.mxu1 %v3336_v10 }
  0xc9   : > { %3018 = vmatpush3.bf16.msra.mxu0 %v3335_v9 }
  0xca   : > { %3019 = vmatprep.subr.bf16.mxu0 %v3338_v12 }
  0xcb   : > { %3040 = vmatpush3.bf16.msra.mxu1 %v3337_v11 }
  0xcc   : > { %3041 = vmatprep.subr.bf16.mxu1 %v3340_v14 }
  0xcd   : > { %3020 = vmatpush3.bf16.msra.mxu0 %v3339_v13 }
  0xce   : > { %3021 = vmatprep.subr.bf16.mxu0 %v3342_v16 }
  0xcf   : > { %3042 = vmatpush3.bf16.msra.mxu1 %v3341_v15 }
  0xd0   : > { %3043 = vmatprep.subr.bf16.mxu1 %v3344_v18 }
  0xd1   : > { %3022 = vmatpush3.bf16.msra.mxu0 %v3343_v17 }
  0xd2   : > { %3060 = vmatprep.subr.bf16.mxu0 %v3427_v22 }
  0xd3   : > { %3044 = vmatpush3.bf16.msra.mxu1 %v3348_v21 }
  0xd4   : > { %2378 = vmatmul.mubr.bf16.vlgmr.msra.gmra.mxu0 %v3345_v19 }
  0xd5   : > { %3076 = vmatprep.mubr.msk.bf16.mxu0 %vm3428_vm0, %v3427_v22  ;;  %3061 = vmatpush3.bf16.msra.mxu0 %v3352_v25 }
  0xd6   : > { %2419 = vmatmul.mubr.bf16.vlgmr.msra.gmra.mxu1 %v3349_v23  ;;  %3062 = vmatprep.subr.bf16.mxu0 %v3427_v22 }
  0xd9   : > { %3063 = vmatpush3.bf16.msra.mxu0 %v3353_v26 }
  0xda   : > { %3064 = vmatprep.subr.bf16.mxu0 %v3427_v22 }
  0xdd   : > { %3065 = vmatpush3.bf16.msra.mxu0 %v3354_v27 }
  0xde   : > { %3066 = vmatprep.subr.bf16.mxu0 %v3427_v22 }
  0xe1   : > { %3067 = vmatpush3.bf16.msra.mxu0 %v3355_v28 }
  0xe2   : > { %3068 = vmatprep.subr.bf16.mxu0 %v3427_v22 }
  0xe5   : > { %3069 = vmatpush3.bf16.msra.mxu0 %v3356_v29 }
  0xe6   : > { %3070 = vmatprep.subr.bf16.mxu0 %v3427_v22 }
  0xe9   : > { %3071 = vmatpush3.bf16.msra.mxu0 %v3357_v30 }
  0xea   : > { %3072 = vmatprep.subr.bf16.mxu0 %v3427_v22 }
  0xed   : > { %3073 = vmatpush3.bf16.msra.mxu0 %v3358_v31 }
  0xee   : > { %3074 = vmatprep.subr.bf16.mxu0 %v3427_v22 }
  0xf1   : > { %3075 = vmatpush3.bf16.msra.mxu0 %v3359_v32 }
  0xf4   : > { %3077 = vmatmul.mubr.bf16.vlgmr.msra.gmra.mxu0 %v3360_v33  ;;  %v2803_v34 = vpop.f32.mrf.mxu0 }
  0xf6   : > { %v2804_v35 = vpop.f32.mrf.mxu0  ;;  %v2825_v36 = vpop.f32.mrf.mxu1 }
  0xf7   : > { %v2805_v63 = vadd.f32 %v2804_v35, %v2803_v34 }
  0xf8   : > { %v2806_v37 = vpop.f32.mrf.mxu0  ;;  %v2826_v38 = vpop.f32.mrf.mxu1 }
  0xf9   : > { %v1970_v3 = vadd.f32 %v2805_v63, %v2555_v0  ;;  %v2827_v4 = vadd.f32 %v2826_v38, %v2825_v36 }
  0xfa   : > { %v2807_v39 = vpop.f32.mrf.mxu0  ;;  %v2828_v40 = vpop.f32.mrf.mxu1 }
  0xfb   : > { %v2808_v5 = vadd.f32 %v2807_v39, %v2806_v37  ;;  %v2011_v9 = vadd.f32 %v2827_v4, %v1970_v3 }
  0xfc   : > { %v2829_v42 = vpop.f32.mrf.mxu1 }
  0xfd   : > { %v1973_v10 = vadd.f32 %v2808_v5, %v2555_v0  ;;  %v2830_v11 = vadd.f32 %v2829_v42, %v2828_v40 }
  0xff   : > { %v2014_v17 = vadd.f32 %v2830_v11, %v1973_v10 }
 0x114   : > { %v2847_v41 = vpop.f32.mrf.mxu0 }
 0x116   : > { %v2848_v43 = vpop.f32.mrf.mxu0  ;;  %v2869_v44 = vpop.f32.mrf.mxu1 }
 0x117   : > { %v2849_v7 = vadd.f32 %v2848_v43, %v2847_v41 }
 0x118   : > { %v2850_v45 = vpop.f32.mrf.mxu0  ;;  %v2870_v46 = vpop.f32.mrf.mxu1 }
 0x119   : > { %v2052_v14 = vadd.f32 %v2849_v7, %v2011_v9  ;;  %v2871_v15 = vadd.f32 %v2870_v46, %v2869_v44 }
 0x11a   : > { %v2851_v47 = vpop.f32.mrf.mxu0  ;;  %v2872_v48 = vpop.f32.mrf.mxu1 }
 0x11b   : > { %v2852_v16 = vadd.f32 %v2851_v47, %v2850_v45  ;;  %v2093_v21 = vadd.f32 %v2871_v15, %v2052_v14 }
 0x11c   : > { %v2873_v50 = vpop.f32.mrf.mxu1 }
 0x11d   : > { %v2055_v22 = vadd.f32 %v2852_v16, %v2014_v17  ;;  %v2874_v23 = vadd.f32 %v2873_v50, %v2872_v48 }
 0x11f   : > { %v2096_v29 = vadd.f32 %v2874_v23, %v2055_v22 }
 0x134   : > { %v2891_v49 = vpop.f32.mrf.mxu0 }
 0x136   : > { %v2892_v51 = vpop.f32.mrf.mxu0  ;;  %v2913_v52 = vpop.f32.mrf.mxu1 }
 0x137   : > { %v2893_v18 = vadd.f32 %v2892_v51, %v2891_v49 }
 0x138   : > { %v2894_v53 = vpop.f32.mrf.mxu0  ;;  %v2914_v54 = vpop.f32.mrf.mxu1 }
 0x139   : > { %v2134_v24 = vadd.f32 %v2893_v18, %v2093_v21  ;;  %v2915_v25 = vadd.f32 %v2914_v54, %v2913_v52 }
 0x13a   : > { %v2895_v55 = vpop.f32.mrf.mxu0  ;;  %v2916_v56 = vpop.f32.mrf.mxu1 }
 0x13b   : > { %v2896_v26 = vadd.f32 %v2895_v55, %v2894_v53  ;;  %v2175_v32 = vadd.f32 %v2915_v25, %v2134_v24 }
 0x13c   : > { %v2917_v58 = vpop.f32.mrf.mxu1 }
 0x13d   : > { %v2137_v33 = vadd.f32 %v2896_v26, %v2096_v29  ;;  %v2918_v34 = vadd.f32 %v2917_v58, %v2916_v56 }
 0x13f   : > { %v2178_v41 = vadd.f32 %v2918_v34, %v2137_v33 }
 0x154   : > { %v2935_v57 = vpop.f32.mrf.mxu0 }
 0x156   : > { %v2936_v59 = vpop.f32.mrf.mxu0  ;;  %v2957_v60 = vpop.f32.mrf.mxu1 }
 0x157   : > { %v2937_v30 = vadd.f32 %v2936_v59, %v2935_v57 }
 0x158   : > { %v2938_v61 = vpop.f32.mrf.mxu0  ;;  %v2958_v62 = vpop.f32.mrf.mxu1 }
 0x159   : > { %v2216_v36 = vadd.f32 %v2937_v30, %v2175_v32  ;;  %v2959_v37 = vadd.f32 %v2958_v62, %v2957_v60 }
 0x15a   : > { %v2939_v1 = vpop.f32.mrf.mxu0  ;;  %v2960_v2 = vpop.f32.mrf.mxu1 }
 0x15b   : > { %v2940_v38 = vadd.f32 %v2939_v1, %v2938_v61  ;;  %v2257_v43 = vadd.f32 %v2959_v37, %v2216_v36 }
 0x15c   : > { %v2961_v8 = vpop.f32.mrf.mxu1 }
 0x15d   : > { %v2219_v44 = vadd.f32 %v2940_v38, %v2178_v41  ;;  %v2962_v45 = vadd.f32 %v2961_v8, %v2960_v2 }
 0x15f   : > { %v2260_v51 = vadd.f32 %v2962_v45, %v2219_v44 }
 0x174   : > { %v2979_v6 = vpop.f32.mrf.mxu0 }
 0x176   : > { %v2980_v12 = vpop.f32.mrf.mxu0  ;;  %v3001_v13 = vpop.f32.mrf.mxu1 }
 0x177   : > { %v2981_v42 = vadd.f32 %v2980_v12, %v2979_v6 }
 0x178   : > { %v2982_v19 = vpop.f32.mrf.mxu0  ;;  %v3002_v20 = vpop.f32.mrf.mxu1 }
 0x179   : > { %v2298_v48 = vadd.f32 %v2981_v42, %v2257_v43  ;;  %v3003_v49 = vadd.f32 %v3002_v20, %v3001_v13 }
 0x17a   : > { %v2983_v27 = vpop.f32.mrf.mxu0  ;;  %v3004_v28 = vpop.f32.mrf.mxu1 }
 0x17b   : > { %v2984_v50 = vadd.f32 %v2983_v27, %v2982_v19  ;;  %v2339_v55 = vadd.f32 %v3003_v49, %v2298_v48 }
 0x17c   : > { %v3005_v35 = vpop.f32.mrf.mxu1 }
 0x17d   : > { %v2301_v56 = vadd.f32 %v2984_v50, %v2260_v51  ;;  %v3006_v57 = vadd.f32 %v3005_v35, %v3004_v28 }
 0x17f   : > { %v2342_v62 = vadd.f32 %v3006_v57, %v2301_v56 }
 0x194   : > { %v3023_v31 = vpop.f32.mrf.mxu0 }
 0x196   : > { %v3024_v39 = vpop.f32.mrf.mxu0  ;;  %v3045_v40 = vpop.f32.mrf.mxu1 }
 0x197   : > { %v3025_v52 = vadd.f32 %v3024_v39, %v3023_v31 }
 0x198   : > { %v3026_v46 = vpop.f32.mrf.mxu0  ;;  %v3046_v47 = vpop.f32.mrf.mxu1 }
 0x199   : > { %v2380_v58 = vadd.f32 %v3025_v52, %v2339_v55  ;;  %v3047_v59 = vadd.f32 %v3046_v47, %v3045_v40 }
 0x19a   : > { %v3027_v53 = vpop.f32.mrf.mxu0  ;;  %v3048_v54 = vpop.f32.mrf.mxu1 }
 0x19b   : > { %v3028_v60 = vadd.f32 %v3027_v53, %v3026_v46  ;;  %v2421_v1 = vadd.f32 %v3047_v59, %v2380_v58 }
 0x19c   : > { %v3049_v61 = vpop.f32.mrf.mxu1 }
 0x19d   : > { %v2383_v63 = vadd.f32 %v3028_v60, %v2342_v62  ;;  %v3050_v0 = vadd.f32 %v3049_v61, %v3048_v54 }
 0x19f   : > { %v2424_v5 = vadd.f32 %v3050_v0, %v2383_v63 }
 0x1b4   : > { %v2461_v2 = vpop.f32.mrf.mxu0 }
 0x1b5   : > { %v2462_v3 = vadd.f32 %v2461_v2, %v2421_v1 }
 0x1b6   : > { %v3078_v4 = vpop.f32.mrf.mxu0 }
 0x1b7   : > { %3361 = vtanh.f32 %v2462_v3 }
 0x1b8   : > { %v2464_v6 = vpop.f32.mrf.mxu0 }
 0x1b9   : > { %v2465_v7 = vadd.f32 %v2464_v6, %v2424_v5 }
 0x1ba   : > { %v3079_v8 = vpop.f32.mrf.mxu0 }
 0x1bb   : > { %3363 = vtanh.f32 %v2465_v7 }
 0x1c4   : > { %v3362_v9 = vpop.eup %3361 }
 0x1c5   : > { %2470 = vst [vmem:[%s166_s19] sm:$0xff] %v3362_v9 }
 0x1c8   : > { %v3364_v10 = vpop.eup %3363 }
 0x1c9   : > { %2471 = vst [vmem:[%s166_s19 + $0x8] sm:$0xff] %v3364_v10 }
 0x1ca   : > { %3378 = shalt.err (!%p3375_p3)
}
 0x1cb   : > { %s3379_s7 = scalar_lea.hbm %s4139_s26, 256  ;;  %s3383_s8 = scalar_lea.hbm %s4186_s3, 512 }
 0x1cc   : > { %p3380_p4 = scmp.ne.s32.totalorder %s4139_s26, %s3379_s7  ;;  %p3384_p9 = scmp.lt.s32.totalorder %s4139_s26, %s4186_s3 }
 0x1cd   : > { %p3385_p10 = scmp.lt.s32.totalorder %s3383_s8, %s3379_s7 }
 0x1ce   : > { %p3381_p7 = pnand %p3380_p4, %p3490_p5 }
 0x1cf   : > { %p3386_p11 = por %p3385_p10, %p3384_p9 }
 0x1d0   : > { %p3382_p8 = pneg %p3381_p7 }
 0x1d2   : > { %p3387_p12 = pnand %p3386_p11, %p3382_p8 }
 0x1d4   : > { %3390 = shalt.err (!%p3387_p12)
}
 0x1d5   : > { %s3430_s10 = smov 128   ;;  %s3431_s11 = smov 8  }
 0x1d6   : > { %3081 = dma.vmem_to_hbm [thread:$0]  (%p3490_p5), %s4141_s20, 256, %s4139_s26, %s4143_s27, %s3430_s10, %s3430_s10, %s3431_s11  }
 0x1d7 PF: > { %p3087_p13 = scmp.ge.s32.totalorder %s3425_s15, 2  ;;  %s2501_s17 = sand.u32 1, %s3413_s12  }
 0x1d8   : > { %s2502_s19 = scalar_lea.sflag [#allocation3], %s2501_s17 }
 0x1d9   : > { %p3084_p0 = pnand %p3087_p13, %p3494_p6 }
 0x1db   : > { %p3085_p1 = pneg %p3084_p0 }
 0x1dd   : > { %3408 = dma.done.wait (%p3085_p1), %s2502_s19, 256  }
 0x1de   : > { %3410 = vsyncadd (%p3085_p1), %s2502_s19, 4294967040  ;;  %p13_p2 = scmp.ge.s32.totalorder %s3477_s18, 4   ;;  %s4189_s12 = smov %s3417_s13 }
 0x1df   : > { %s4190_s13 = smov %s3421_s14  ;;  %s4191_s14 = smov %s3488_s21 }
 0x1e0   : > { %s4192_s15 = smov %s3477_s18  ;;  %15 = sbr.rel (!%p13_p2) target bundleno = 3 (0x3), region = 67 }
 0x1e5   :  { %2507 = vsyncpa [#allocation3], 1 }
 0x1e6   :  { %2509 = vsyncpa [#allocation3 + $0x1], 1 }

</bundles_post_ra>
